<compile_context>
chip_gen: v5e
topology: v5e:2x2
jax: 0.10.0
libtpu: 0.0.40
codegen_flags: <defaults>
</compile_context>

<pallas_src>
import jax
import jax.numpy as jnp
from jax.experimental import pallas as pl
from jax.experimental.pallas import tpu as pltpu


def _same_pad(k):
    """PyTorch Conv1dSame padding split: (ka, kb)."""
    ka = k // 2
    kb = ka - 1 if k % 2 == 0 else ka
    return ka, kb


# ----------------------------------------------------------------------------
# Fused kernel: conv1(im2col) -> conv2 -> conv3 -> GAP -> Linear
# ----------------------------------------------------------------------------
def convnet_kernel(p1_ref, w1_ref, b1_ref, w2_ref, b2_ref, w3_ref, b3_ref,
                   wl_ref, bl_ref, o_ref):
    """Full forward for one batch tile; all intermediates stay on-chip.

    p1_ref: (bt, L, K1*C_in) bf16   im2col patches of reflect-padded input
    w1_ref: (K1*C_in, C1)    bf16   layer-1 weights (BN folded)
    b1_ref: (1, C1)          f32
    w2_ref: (K2*C1, C2)      bf16   layer-2 weights (BN folded, im2col layout)
    b2_ref: (1, C2)          f32
    w3_ref: (K3*C2, C3)      bf16   layer-3 weights (no BN)
    b3_ref: (1, C3)          f32
    wl_ref: (C3, nb_class)   bf16   final linear weights (GAP 1/L folded in)
    bl_ref: (1, nb_class)    f32
    o_ref:  (bt, nb_class)   f32
    """
    bt, L, kc1 = p1_ref.shape
    C1 = w1_ref.shape[1]
    C2 = w2_ref.shape[1]
    C3 = w3_ref.shape[1]
    K2 = w2_ref.shape[0] // C1
    K3 = w3_ref.shape[0] // C2
    rows = bt * L

    def reflect_pad(h, ka, kb):
        # PyTorch ReflectionPad1d((ka, kb)) along the length axis, built as a
        # value in a single concatenate (one op; no per-row masked stores).
        parts = [h[:, i:i + 1, :] for i in range(ka, 0, -1)]        # h[ka..1]
        parts.append(h)
        parts += [h[:, L - 2 - i:L - 1 - i, :] for i in range(kb)]  # h[L-2..]
        return jnp.concatenate(parts, axis=1)

    def im2col(hpad, K, C):
        # (bt, L+K-1, C) -> (rows, K*C); columns ordered (tap, channel) to
        # match the (K, C_in, C_out).reshape(K*C_in, C_out) weight layout.
        taps = [hpad[:, k:k + L, :] for k in range(K)]
        return jnp.concatenate(taps, axis=-1).reshape(rows, K * C)

    # ---- layer 1: one (rows, K1*C_in) x (K1*C_in, C1) MXU matmul + bias+ReLU
    h1 = jnp.dot(p1_ref[...].reshape(rows, kc1), w1_ref[...],
                 preferred_element_type=jnp.float32)
    h1 = jnp.maximum(h1 + b1_ref[...], 0.0)
    h1 = h1.astype(jnp.bfloat16).reshape(bt, L, C1)       # cast to bf16 once

    # ---- layer 2: reflect-pad + im2col -> one 640-deep contraction matmul
    ka2, kb2 = _same_pad(K2)
    p2 = im2col(reflect_pad(h1, ka2, kb2), K2, C1)        # (rows, K2*C1) bf16
    h2 = jnp.dot(p2, w2_ref[...], preferred_element_type=jnp.float32)
    h2 = jnp.maximum(h2 + b2_ref[...], 0.0)
    h2 = h2.astype(jnp.bfloat16).reshape(bt, L, C2)       # cast to bf16 once

    # ---- layer 3: reflect-pad + im2col -> one 768-deep contraction matmul
    ka3, kb3 = _same_pad(K3)
    p3 = im2col(reflect_pad(h2, ka3, kb3), K3, C2)        # (rows, K3*C2) bf16
    h3 = jnp.dot(p3, w3_ref[...], preferred_element_type=jnp.float32)
    h3 = jnp.maximum(h3 + b3_ref[...], 0.0)               # (rows, C3) f32

    # ---- GAP (1/L folded into wl at prep time) + Linear, fused
    pooled = jnp.sum(h3.reshape(bt, L, C3), axis=1)       # (bt, C3) f32
    out = jnp.dot(pooled.astype(jnp.bfloat16), wl_ref[...],
                  preferred_element_type=jnp.float32) + bl_ref[...]
    o_ref[...] = out.astype(o_ref.dtype)


# ----------------------------------------------------------------------------
# Wrapper: batch tiling, layer-1 im2col, pallas_call plumbing
# ----------------------------------------------------------------------------
def _pick_batch_tile(B, L, target_rows=512, min_rows=256):
    """Rows per grid step = bt * L.

    Target ~512 rows so the 256-wide MXU of v6e/v7x (and 128-wide v5e) stays
    busy; never split the grid into multiple steps unless each step still gets
    >= min_rows rows (splitting for v7x's 2 TCs only pays when each TC keeps an
    MXU-shaped tile). When splitting, bt is a multiple of 8 so the
    (bt, nb_class) output block tiles cleanly.
    """
    if B * L <= 2 * min_rows:
        return B                                    # tiny problem: one step
    bt = max(target_rows // max(L, 1), -(-min_rows // L), 1)
    bt = -(-bt // 8) * 8
    return min(bt, B)


def convnet_pallas(patches, w1f, b1f, w2f, b2f, w3f, b3f, wlf, blf):
    B, L, kc1 = patches.shape
    C1 = w1f.shape[1]
    C2 = w2f.shape[1]
    C3 = w3f.shape[1]
    nb_class = wlf.shape[1]

    bt = _pick_batch_tile(B, L)
    n_blocks = -(-B // bt)
    Bp = n_blocks * bt
    if Bp != B:  # pad batch so it divides into bt-sized blocks
        patches = jnp.pad(patches, ((0, Bp - B), (0, 0), (0, 0)))

    out = pl.pallas_call(
        convnet_kernel,
        out_shape=jax.ShapeDtypeStruct((Bp, nb_class), jnp.float32),
        grid=(n_blocks,),
        in_specs=[
            pl.BlockSpec((bt, L, kc1), lambda b: (b, 0, 0)),
            # Weights/biases have constant index_maps -> fetched once and kept
            # resident; total weight footprint ~0.5 MiB, far below VMEM.
            pl.BlockSpec((kc1, C1), lambda b: (0, 0)),
            pl.BlockSpec((1, C1), lambda b: (0, 0)),
            pl.BlockSpec((w2f.shape[0], C2), lambda b: (0, 0)),
            pl.BlockSpec((1, C2), lambda b: (0, 0)),
            pl.BlockSpec((w3f.shape[0], C3), lambda b: (0, 0)),
            pl.BlockSpec((1, C3), lambda b: (0, 0)),
            pl.BlockSpec((C3, nb_class), lambda b: (0, 0)),
            pl.BlockSpec((1, nb_class), lambda b: (0, 0)),
        ],
        out_specs=pl.BlockSpec((bt, nb_class), lambda b: (b, 0)),
        compiler_params=pltpu.CompilerParams(
            dimension_semantics=("parallel",),
            # Working set is <2 MiB even at 512 rows; 32 MiB is safe on
            # v5e/v6e/v7x alike.
            vmem_limit_bytes=32 * 1024 * 1024,
        ),
    )(patches, w1f, b1f, w2f, b2f, w3f, b3f, wlf, blf)
    return out[:B] if Bp != B else out


# ----------------------------------------------------------------------------
# Parameters (PyTorch-equivalent values) and BN/bias/GAP folding
# ----------------------------------------------------------------------------
def make_params(key, in_channels=1, nb_class=2):
    def conv_params(k, c_in, c_out, ksize):
        kw, kb = jax.random.split(k)
        # Stored as (K, C_in, C_out); PyTorch layout (C_out, C_in, K) is the
        # same values transposed.
        w = 0.1 * jax.random.normal(kw, (ksize, c_in, c_out), jnp.float32)
        b = 0.1 * jax.random.normal(kb, (c_out,), jnp.float32)
        return w, b

    k1, k2, k3, k4 = jax.random.split(key, 4)
    p = {}
    p["w1"], p["b1"] = conv_params(k1, in_channels, 128, 8)
    p["w2"], p["b2"] = conv_params(k2, 128, 256, 5)
    p["w3"], p["b3"] = conv_params(k3, 256, 128, 3)

    # BatchNorm1d default init (eval mode): gamma=1, beta=0, mean=0, var=1.
    for name, c in (("bn1", 128), ("bn2", 256)):
        p[name + "_gamma"] = jnp.ones((c,), jnp.float32)
        p[name + "_beta"] = jnp.zeros((c,), jnp.float32)
        p[name + "_mean"] = jnp.zeros((c,), jnp.float32)
        p[name + "_var"] = jnp.ones((c,), jnp.float32)

    kw, kb = jax.random.split(k4)
    p["lin_w"] = 0.1 * jax.random.normal(kw, (128, nb_class), jnp.float32)
    p["lin_b"] = 0.1 * jax.random.normal(kb, (nb_class,), jnp.float32)
    return p


def fold_params(p, seq_len, eps=1e-5):
    """Fold eval-mode BN + conv bias into weights/bias, flatten conv weights to
    im2col layout, fold GAP's 1/L into the final linear weights, cast matmul
    operands to bf16 (biases stay f32)."""
    def fold_bn(w, b, gamma, beta, mean, var):
        s = gamma * jax.lax.rsqrt(var + eps)                    # (C_out,)
        wf = (w * s[None, None, :]).astype(jnp.bfloat16)
        bf = (b * s + beta - mean * s).reshape(1, -1).astype(jnp.float32)
        return wf, bf

    w1f, b1f = fold_bn(p["w1"], p["b1"], p["bn1_gamma"], p["bn1_beta"],
                       p["bn1_mean"], p["bn1_var"])
    K1, c_in1, C1 = p["w1"].shape
    w1f = w1f.reshape(K1 * c_in1, C1)      # im2col layout, rows ordered (k, c)

    w2f, b2f = fold_bn(p["w2"], p["b2"], p["bn2_gamma"], p["bn2_beta"],
                       p["bn2_mean"], p["bn2_var"])
    K2, c_in2, C2 = p["w2"].shape
    w2f = w2f.reshape(K2 * c_in2, C2)

    K3, c_in3, C3 = p["w3"].shape
    w3f = p["w3"].astype(jnp.bfloat16).reshape(K3 * c_in3, C3)
    b3f = p["b3"].reshape(1, -1).astype(jnp.float32)

    # GAP's 1/L folded here so the kernel can use a plain sum.
    wlf = (p["lin_w"] / float(seq_len)).astype(jnp.bfloat16)
    blf = p["lin_b"].reshape(1, -1).astype(jnp.float32)
    return w1f, b1f, w2f, b2f, w3f, b3f, wlf, blf


# ----------------------------------------------------------------------------
# Forward pass
# ----------------------------------------------------------------------------
@jax.jit
def convnet_forward(x_ncl, params):
    B, C_in, L = x_ncl.shape
    K1 = params["w1"].shape[0]
    K2 = params["w2"].shape[0]
    K3 = params["w3"].shape[0]
    # PyTorch ReflectionPad1d requires pad < input length for EVERY layer.
    for K in (K1, K2, K3):
        ka, kb = _same_pad(K)
        assert L > ka and L > kb, "reflection padding needs pad < L"

    ka1, kb1 = _same_pad(K1)
    # PyTorch NCL -> (B, L, C_in); for C_in == 1 a reshape is layout-only.
    if C_in == 1:
        x = x_ncl.reshape(B, L, 1)
    else:
        x = jnp.transpose(x_ncl, (0, 2, 1))
    x = x.astype(jnp.bfloat16)

    # Layer-1 im2col in the wrapper (tiny for small C_in): reflect-pad along L
    # and stack the K1 taps on the lane axis -> (B, L, K1*C_in).
    xp = jnp.pad(x, ((0, 0), (ka1, kb1), (0, 0)), mode="reflect")
    patches = jnp.concatenate([xp[:, k:k + L, :] for k in range(K1)], axis=-1)

    folded = fold_params(params, L)
    return convnet_pallas(patches, *folded)


if __name__ == "__main__":
    key = jax.random.PRNGKey(0)
    k_x, k_p = jax.random.split(key)

    B, C_in, L, nb_class = 2, 1, 16, 2
    x = jax.random.normal(k_x, (B, C_in, L), jnp.float32)   # PyTorch NCL input
    params = make_params(k_p, in_channels=C_in, nb_class=nb_class)

    out = convnet_forward(x, params)
    jax.block_until_ready(out)
    assert out.shape == (B, nb_class), out.shape
    print("KERNEL_OK")
</pallas_src>

<mosaic_0001>
module attributes {stable_mosaic.version = 11 : i64} {
  func.func @convnet_kernel(%arg0: i32, %arg1: memref<2x16x8xbf16, #tpu.memory_space<vmem>>, %arg2: memref<8x128xbf16, #tpu.memory_space<vmem>>, %arg3: memref<1x128xf32, #tpu.memory_space<vmem>>, %arg4: memref<640x256xbf16, #tpu.memory_space<vmem>>, %arg5: memref<1x256xf32, #tpu.memory_space<vmem>>, %arg6: memref<768x128xbf16, #tpu.memory_space<vmem>>, %arg7: memref<1x128xf32, #tpu.memory_space<vmem>>, %arg8: memref<128x2xbf16, #tpu.memory_space<vmem>>, %arg9: memref<1x2xf32, #tpu.memory_space<vmem>>, %arg10: memref<2x2xf32, #tpu.memory_space<vmem>>) attributes {dimension_semantics = [#tpu.dimension_semantics<parallel>], iteration_bounds = array<i64: 1>, scalar_prefetch = 0 : i64, scratch_operands = 0 : i64, tpu.core_type = #tpu.core_type<tc>, window_params = [{transform_indices = @transform_0, window_bounds = array<i64: 2, 16, 8>}, {pipeline_mode = #tpu.pipeline_mode<synchronous>, transform_indices = @transform_1, window_bounds = array<i64: 8, 128>}, {pipeline_mode = #tpu.pipeline_mode<synchronous>, transform_indices = @transform_2, window_bounds = array<i64: 1, 128>}, {pipeline_mode = #tpu.pipeline_mode<synchronous>, transform_indices = @transform_3, window_bounds = array<i64: 640, 256>}, {pipeline_mode = #tpu.pipeline_mode<synchronous>, transform_indices = @transform_4, window_bounds = array<i64: 1, 256>}, {pipeline_mode = #tpu.pipeline_mode<synchronous>, transform_indices = @transform_5, window_bounds = array<i64: 768, 128>}, {pipeline_mode = #tpu.pipeline_mode<synchronous>, transform_indices = @transform_6, window_bounds = array<i64: 1, 128>}, {pipeline_mode = #tpu.pipeline_mode<synchronous>, transform_indices = @transform_7, window_bounds = array<i64: 128, 2>}, {pipeline_mode = #tpu.pipeline_mode<synchronous>, transform_indices = @transform_8, window_bounds = array<i64: 1, 2>}, {transform_indices = @transform_9, window_bounds = array<i64: 2, 2>}]} {
    %c0 = arith.constant 0 : index
    %c0_0 = arith.constant 0 : index
    %c0_1 = arith.constant 0 : index
    %0 = vector.load %arg1[%c0, %c0_0, %c0_1] : memref<2x16x8xbf16, #tpu.memory_space<vmem>>, vector<2x16x8xbf16>
    %1 = vector.shape_cast %0 : vector<2x16x8xbf16> to vector<32x8xbf16>
    %c0_2 = arith.constant 0 : index
    %c0_3 = arith.constant 0 : index
    %2 = vector.load %arg2[%c0_2, %c0_3] : memref<8x128xbf16, #tpu.memory_space<vmem>>, vector<8x128xbf16>
    %cst = arith.constant dense<0.000000e+00> : vector<32x128xf32>
    %3 = tpu.matmul %1, %2, %cst {dimension_numbers = #tpu.dot_dimension_numbers<[1], [0], [0], [1], [0, 0, 1, 1], [], []>} : vector<32x8xbf16>, vector<8x128xbf16>, vector<32x128xf32> -> vector<32x128xf32>
    %c0_4 = arith.constant 0 : index
    %c0_5 = arith.constant 0 : index
    %4 = vector.load %arg3[%c0_4, %c0_5] : memref<1x128xf32, #tpu.memory_space<vmem>>, vector<1x128xf32>
    %5 = vector.broadcast %4 : vector<1x128xf32> to vector<32x128xf32>
    %6 = arith.addf %3, %5 : vector<32x128xf32>
    %cst_6 = arith.constant 0.000000e+00 : f32
    %7 = vector.broadcast %cst_6 : f32 to vector<32x128xf32>
    %8 = arith.maximumf %6, %7 : vector<32x128xf32>
    %9 = arith.truncf %8 : vector<32x128xf32> to vector<32x128xbf16>
    %10 = vector.shape_cast %9 : vector<32x128xbf16> to vector<2x16x128xbf16>
    %11 = vector.extract_strided_slice %10 {offsets = [0, 2, 0], sizes = [2, 1, 128], strides = [1, 1, 1]} : vector<2x16x128xbf16> to vector<2x1x128xbf16>
    %12 = vector.extract_strided_slice %10 {offsets = [0, 1, 0], sizes = [2, 1, 128], strides = [1, 1, 1]} : vector<2x16x128xbf16> to vector<2x1x128xbf16>
    %13 = vector.extract_strided_slice %10 {offsets = [0, 14, 0], sizes = [2, 1, 128], strides = [1, 1, 1]} : vector<2x16x128xbf16> to vector<2x1x128xbf16>
    %14 = vector.extract_strided_slice %10 {offsets = [0, 13, 0], sizes = [2, 1, 128], strides = [1, 1, 1]} : vector<2x16x128xbf16> to vector<2x1x128xbf16>
    %15 = tpu.concatenate %11, %12, %10, %13, %14 in 1 : vector<2x1x128xbf16>, vector<2x1x128xbf16>, vector<2x16x128xbf16>, vector<2x1x128xbf16>, vector<2x1x128xbf16> -> vector<2x20x128xbf16>
    %16 = vector.extract_strided_slice %15 {offsets = [0, 0, 0], sizes = [2, 16, 128], strides = [1, 1, 1]} : vector<2x20x128xbf16> to vector<2x16x128xbf16>
    %17 = vector.extract_strided_slice %15 {offsets = [0, 1, 0], sizes = [2, 16, 128], strides = [1, 1, 1]} : vector<2x20x128xbf16> to vector<2x16x128xbf16>
    %18 = vector.extract_strided_slice %15 {offsets = [0, 2, 0], sizes = [2, 16, 128], strides = [1, 1, 1]} : vector<2x20x128xbf16> to vector<2x16x128xbf16>
    %19 = vector.extract_strided_slice %15 {offsets = [0, 3, 0], sizes = [2, 16, 128], strides = [1, 1, 1]} : vector<2x20x128xbf16> to vector<2x16x128xbf16>
    %20 = vector.extract_strided_slice %15 {offsets = [0, 4, 0], sizes = [2, 16, 128], strides = [1, 1, 1]} : vector<2x20x128xbf16> to vector<2x16x128xbf16>
    %21 = tpu.concatenate %16, %17, %18, %19, %20 in 2 : vector<2x16x128xbf16>, vector<2x16x128xbf16>, vector<2x16x128xbf16>, vector<2x16x128xbf16>, vector<2x16x128xbf16> -> vector<2x16x640xbf16>
    %22 = vector.shape_cast %21 : vector<2x16x640xbf16> to vector<32x640xbf16>
    %c0_7 = arith.constant 0 : index
    %c0_8 = arith.constant 0 : index
    %23 = vector.load %arg4[%c0_7, %c0_8] : memref<640x256xbf16, #tpu.memory_space<vmem>>, vector<640x256xbf16>
    %cst_9 = arith.constant dense<0.000000e+00> : vector<32x256xf32>
    %24 = tpu.matmul %22, %23, %cst_9 {dimension_numbers = #tpu.dot_dimension_numbers<[1], [0], [0], [1], [0, 0, 1, 1], [], []>} : vector<32x640xbf16>, vector<640x256xbf16>, vector<32x256xf32> -> vector<32x256xf32>
    %c0_10 = arith.constant 0 : index
    %c0_11 = arith.constant 0 : index
    %25 = vector.load %arg5[%c0_10, %c0_11] : memref<1x256xf32, #tpu.memory_space<vmem>>, vector<1x256xf32>
    %26 = vector.broadcast %25 : vector<1x256xf32> to vector<32x256xf32>
    %27 = arith.addf %24, %26 : vector<32x256xf32>
    %cst_12 = arith.constant 0.000000e+00 : f32
    %28 = vector.broadcast %cst_12 : f32 to vector<32x256xf32>
    %29 = arith.maximumf %27, %28 : vector<32x256xf32>
    %30 = arith.truncf %29 : vector<32x256xf32> to vector<32x256xbf16>
    %31 = vector.shape_cast %30 : vector<32x256xbf16> to vector<2x16x256xbf16>
    %32 = vector.extract_strided_slice %31 {offsets = [0, 1, 0], sizes = [2, 1, 256], strides = [1, 1, 1]} : vector<2x16x256xbf16> to vector<2x1x256xbf16>
    %33 = vector.extract_strided_slice %31 {offsets = [0, 14, 0], sizes = [2, 1, 256], strides = [1, 1, 1]} : vector<2x16x256xbf16> to vector<2x1x256xbf16>
    %34 = tpu.concatenate %32, %31, %33 in 1 : vector<2x1x256xbf16>, vector<2x16x256xbf16>, vector<2x1x256xbf16> -> vector<2x18x256xbf16>
    %35 = vector.extract_strided_slice %34 {offsets = [0, 0, 0], sizes = [2, 16, 256], strides = [1, 1, 1]} : vector<2x18x256xbf16> to vector<2x16x256xbf16>
    %36 = vector.extract_strided_slice %34 {offsets = [0, 1, 0], sizes = [2, 16, 256], strides = [1, 1, 1]} : vector<2x18x256xbf16> to vector<2x16x256xbf16>
    %37 = vector.extract_strided_slice %34 {offsets = [0, 2, 0], sizes = [2, 16, 256], strides = [1, 1, 1]} : vector<2x18x256xbf16> to vector<2x16x256xbf16>
    %38 = tpu.concatenate %35, %36, %37 in 2 : vector<2x16x256xbf16>, vector<2x16x256xbf16>, vector<2x16x256xbf16> -> vector<2x16x768xbf16>
    %39 = vector.shape_cast %38 : vector<2x16x768xbf16> to vector<32x768xbf16>
    %c0_13 = arith.constant 0 : index
    %c0_14 = arith.constant 0 : index
    %40 = vector.load %arg6[%c0_13, %c0_14] : memref<768x128xbf16, #tpu.memory_space<vmem>>, vector<768x128xbf16>
    %cst_15 = arith.constant dense<0.000000e+00> : vector<32x128xf32>
    %41 = tpu.matmul %39, %40, %cst_15 {dimension_numbers = #tpu.dot_dimension_numbers<[1], [0], [0], [1], [0, 0, 1, 1], [], []>} : vector<32x768xbf16>, vector<768x128xbf16>, vector<32x128xf32> -> vector<32x128xf32>
    %c0_16 = arith.constant 0 : index
    %c0_17 = arith.constant 0 : index
    %42 = vector.load %arg7[%c0_16, %c0_17] : memref<1x128xf32, #tpu.memory_space<vmem>>, vector<1x128xf32>
    %43 = vector.broadcast %42 : vector<1x128xf32> to vector<32x128xf32>
    %44 = arith.addf %41, %43 : vector<32x128xf32>
    %cst_18 = arith.constant 0.000000e+00 : f32
    %45 = vector.broadcast %cst_18 : f32 to vector<32x128xf32>
    %46 = arith.maximumf %44, %45 : vector<32x128xf32>
    %47 = vector.shape_cast %46 : vector<32x128xf32> to vector<2x16x128xf32>
    %cst_19 = arith.constant dense<0.000000e+00> : vector<2x128xf32>
    %48 = vector.multi_reduction <add>, %47, %cst_19 [1] : vector<2x16x128xf32> to vector<2x128xf32>
    %49 = arith.truncf %48 : vector<2x128xf32> to vector<2x128xbf16>
    %c0_20 = arith.constant 0 : index
    %c0_21 = arith.constant 0 : index
    %50 = vector.load %arg8[%c0_20, %c0_21] : memref<128x2xbf16, #tpu.memory_space<vmem>>, vector<128x2xbf16>
    %cst_22 = arith.constant dense<0.000000e+00> : vector<2x2xf32>
    %51 = tpu.matmul %49, %50, %cst_22 {dimension_numbers = #tpu.dot_dimension_numbers<[1], [0], [0], [1], [0, 0, 1, 1], [], []>} : vector<2x128xbf16>, vector<128x2xbf16>, vector<2x2xf32> -> vector<2x2xf32>
    %c0_23 = arith.constant 0 : index
    %c0_24 = arith.constant 0 : index
    %52 = vector.load %arg9[%c0_23, %c0_24] : memref<1x2xf32, #tpu.memory_space<vmem>>, vector<1x2xf32>
    %53 = vector.broadcast %52 : vector<1x2xf32> to vector<2x2xf32>
    %54 = arith.addf %51, %53 : vector<2x2xf32>
    %c0_25 = arith.constant 0 : index
    %c0_26 = arith.constant 0 : index
    %55 = vector.load %arg10[%c0_25, %c0_26] : memref<2x2xf32, #tpu.memory_space<vmem>>, vector<2x2xf32>
    tpu.vector_store %arg10[%c0_25, %c0_26], %54 {strides = array<i32>} : memref<2x2xf32, #tpu.memory_space<vmem>>, vector<2x2xf32>,
    return
  }
  func.func @transform_0(%arg0: i32) -> (i32, i32, i32) {
    %c0_i32 = arith.constant 0 : i32
    %c0_i32_0 = arith.constant 0 : i32
    %c0_i32_1 = arith.constant 0 : i32
    return %arg0, %c0_i32, %c0_i32_0 : i32, i32, i32
  }
  func.func @transform_1(%arg0: i32) -> (i32, i32) {
    %c0_i32 = arith.constant 0 : i32
    %c0_i32_0 = arith.constant 0 : i32
    %c0_i32_1 = arith.constant 0 : i32
    return %c0_i32, %c0_i32_0 : i32, i32
  }
  func.func @transform_2(%arg0: i32) -> (i32, i32) {
    %c0_i32 = arith.constant 0 : i32
    %c0_i32_0 = arith.constant 0 : i32
    %c0_i32_1 = arith.constant 0 : i32
    return %c0_i32, %c0_i32_0 : i32, i32
  }
  func.func @transform_3(%arg0: i32) -> (i32, i32) {
    %c0_i32 = arith.constant 0 : i32
    %c0_i32_0 = arith.constant 0 : i32
    %c0_i32_1 = arith.constant 0 : i32
    return %c0_i32, %c0_i32_0 : i32, i32
  }
  func.func @transform_4(%arg0: i32) -> (i32, i32) {
    %c0_i32 = arith.constant 0 : i32
    %c0_i32_0 = arith.constant 0 : i32
    %c0_i32_1 = arith.constant 0 : i32
    return %c0_i32, %c0_i32_0 : i32, i32
  }
  func.func @transform_5(%arg0: i32) -> (i32, i32) {
    %c0_i32 = arith.constant 0 : i32
    %c0_i32_0 = arith.constant 0 : i32
    %c0_i32_1 = arith.constant 0 : i32
    return %c0_i32, %c0_i32_0 : i32, i32
  }
  func.func @transform_6(%arg0: i32) -> (i32, i32) {
    %c0_i32 = arith.constant 0 : i32
    %c0_i32_0 = arith.constant 0 : i32
    %c0_i32_1 = arith.constant 0 : i32
    return %c0_i32, %c0_i32_0 : i32, i32
  }
  func.func @transform_7(%arg0: i32) -> (i32, i32) {
    %c0_i32 = arith.constant 0 : i32
    %c0_i32_0 = arith.constant 0 : i32
    %c0_i32_1 = arith.constant 0 : i32
    return %c0_i32, %c0_i32_0 : i32, i32
  }
  func.func @transform_8(%arg0: i32) -> (i32, i32) {
    %c0_i32 = arith.constant 0 : i32
    %c0_i32_0 = arith.constant 0 : i32
    %c0_i32_1 = arith.constant 0 : i32
    return %c0_i32, %c0_i32_0 : i32, i32
  }
  func.func @transform_9(%arg0: i32) -> (i32, i32) {
    %c0_i32 = arith.constant 0 : i32
    %c0_i32_0 = arith.constant 0 : i32
    return %arg0, %c0_i32 : i32, i32
  }
}

</mosaic_0001>

<bundles_post_ra>
// kernel: convnet_forward.1
= control target key start
LH: loop header
LB: loop body
LE: loop exit
PB: predicated region body
PF: predicated region fallthrough
CT: control target
= control target key end

     0   :  { %vm60_vm0 = vcmask 1043456   ;;  %vm53_vm1 = vcmask 64512   ;;  %s3370_s0 = inlined_call_operand.vmem [shape: bf16[2,16,8], index: 0, kind: input, shape index: {}]   ;;  %s3371_s1 = inlined_call_operand.vmem [shape: bf16[8,128], index: 1, kind: input, shape index: {}]   ;;  %s3372_s2 = inlined_call_operand.vmem [shape: f32[1,128], index: 2, kind: input, shape index: {}]   ;;  %s3373_s3 = inlined_call_operand.vmem [shape: bf16[640,256], index: 3, kind: input, shape index: {}]   ;;  %s3374_s4 = inlined_call_operand.vmem [shape: f32[1,256], index: 4, kind: input, shape index: {}]   ;;  %s3375_s5 = inlined_call_operand.vmem [shape: bf16[768,128], index: 5, kind: input, shape index: {}]   ;;  %s3376_s6 = inlined_call_operand.vmem [shape: f32[1,128], index: 6, kind: input, shape index: {}]   ;;  %s3377_s7 = inlined_call_operand.vmem [shape: bf16[128,2], index: 7, kind: input, shape index: {}]   ;;  %s3378_s8 = inlined_call_operand.vmem [shape: f32[1,2], index: 8, kind: input, shape index: {}]   ;;  %s3379_s9 = inlined_call_operand.hbm [shape: f32[2,2], index: 9, kind: output, shape index: {}]  }
   0x1   :  { %v38_v0 = vld [vmem:[%s3371_s1] sm:$0xf]  ;;  %v1775_v3 = vld [vmem:[%s3373_s3 + $0x70] sm:$0xf]  ;;  %v2278_v4 = vld [vmem:[%s3373_s3 + $0x74] sm:$0xf0] }
   0x2   :  { %v2261_v1 = vld [vmem:[%s3370_s0] sm:$0xff]  ;;  %v62_v2 = vsel %vm60_vm0, %v38_v0, 0  ;;  %v1776_v5 = vor.u32 %v2278_v4, %v1775_v3  ;;  %v2276_v7 = vld [vmem:[%s3373_s3 + $0x64] sm:$0xf0]  ;;  %v1903_v8 = vld [vmem:[%s3373_s3 + $0x170] sm:$0xf] }
   0x3   :  { %71 = vmatpush.bf16.msra.mxu0 %v62_v2  ;;  %v1767_v6 = vld [vmem:[%s3373_s3 + $0x60] sm:$0xf]  ;;  %v2310_v9 = vld [vmem:[%s3373_s3 + $0x174] sm:$0xf0]  ;;  %v1839_v10 = vld [vmem:[%s3373_s3 + $0xf0] sm:$0xf] }
   0x4   :  { %v2294_v11 = vld [vmem:[%s3373_s3 + $0xf4] sm:$0xf0]  ;;  %696 = vmatpush.bf16.msra.mxu1 %v1776_v5  ;;  %v1768_v12 = vor.u32 %v2276_v7, %v1767_v6  ;;  %v1904_v13 = vor.u32 %v2310_v9, %v1903_v8  ;;  %v1759_v15 = vld [vmem:[%s3373_s3 + $0x50] sm:$0xf]  ;;  %v1895_v17 = vld [vmem:[%s3373_s3 + $0x160] sm:$0xf] }
   0x5   :  { %v1840_v14 = vor.u32 %v2294_v11, %v1839_v10  ;;  %v2274_v16 = vld [vmem:[%s3373_s3 + $0x54] sm:$0xf0]  ;;  %v2308_v18 = vld [vmem:[%s3373_s3 + $0x164] sm:$0xf0]  ;;  %v1967_v19 = vld [vmem:[%s3373_s3 + $0x1f0] sm:$0xf] }
   0x6   :  { %1715 = vmatmul.msk.bf16.vlgmr.msra.gmra.mxu0 %vm53_vm1, %v2261_v1  ;;  %v2326_v20 = vld [vmem:[%s3373_s3 + $0x1f4] sm:$0xf0]  ;;  %734 = vmatpush.bf16.msra.mxu3 %v1904_v13  ;;  %v1896_v21 = vor.u32 %v2308_v18, %v1895_v17 }
   0x7   :  { %715 = vmatpush.bf16.msra.mxu2 %v1840_v14  ;;  %v1968_v22 = vor.u32 %v2326_v20, %v1967_v19 }
   0x8   :  { %14 = vsyncpa [#allocation3], 0  ;;  %697 = vmatpush.bf16.msra.mxu1 %v1768_v12  ;;  %v1760_v23 = vor.u32 %v2274_v16, %v1759_v15  ;;  %v2262_v24 = vld [vmem:[%s3370_s0 + $0x8] sm:$0xff]  ;;  %v1831_v25 = vld [vmem:[%s3373_s3 + $0xe0] sm:$0xf]  ;;  %vm117_vm2 = vcmask 1040384  }
   0x9   :  { %753 = vmatpush.bf16.msrb.mxu0 %v1968_v22  ;;  %v2292_v26 = vld [vmem:[%s3373_s3 + $0xe4] sm:$0xf0]  ;;  %v1751_v28 = vld [vmem:[%s3373_s3 + $0x40] sm:$0xf]  ;;  %v1887_v30 = vld [vmem:[%s3373_s3 + $0x150] sm:$0xf] }
   0xa   :  { %735 = vmatpush.bf16.msra.mxu3 %v1896_v21  ;;  %v1832_v27 = vor.u32 %v2292_v26, %v1831_v25  ;;  %v2272_v29 = vld [vmem:[%s3373_s3 + $0x44] sm:$0xf0]  ;;  %v2306_v32 = vld [vmem:[%s3373_s3 + $0x154] sm:$0xf0]  ;;  %v1959_v33 = vld [vmem:[%s3373_s3 + $0x1e0] sm:$0xf] }
   0xb   :  { %v1752_v31 = vor.u32 %v2272_v29, %v1751_v28  ;;  %v2324_v34 = vld [vmem:[%s3373_s3 + $0x1e4] sm:$0xf0]  ;;  %v1888_v35 = vor.u32 %v2306_v32, %v1887_v30  ;;  %v1823_v37 = vld [vmem:[%s3373_s3 + $0xd0] sm:$0xf]  ;;  %v2290_v38 = vld [vmem:[%s3373_s3 + $0xd4] sm:$0xf0] }
   0xc   :  { %698 = vmatpush.bf16.msra.mxu1 %v1760_v23  ;;  %716 = vmatpush.bf16.msra.mxu2 %v1832_v27  ;;  %v1960_v36 = vor.u32 %v2324_v34, %v1959_v33  ;;  %v1824_v39 = vor.u32 %v2290_v38, %v1823_v37  ;;  %v1743_v40 = vld [vmem:[%s3373_s3 + $0x30] sm:$0xf]  ;;  %v2270_v41 = vld [vmem:[%s3373_s3 + $0x34] sm:$0xf0]  ;;  %v1879_v42 = vld [vmem:[%s3373_s3 + $0x140] sm:$0xf] }
   0xd   :  { %v1744_v43 = vor.u32 %v2270_v41, %v1743_v40  ;;  %v2304_v44 = vld [vmem:[%s3373_s3 + $0x144] sm:$0xf0]  ;;  %v1951_v45 = vld [vmem:[%s3373_s3 + $0x1d0] sm:$0xf]  ;;  %v2322_v46 = vld [vmem:[%s3373_s3 + $0x1d4] sm:$0xf0] }
   0xe   :  { %736 = vmatpush.bf16.msra.mxu3 %v1888_v35  ;;  %754 = vmatpush.bf16.msrb.mxu0 %v1960_v36  ;;  %v1880_v47 = vor.u32 %v2304_v44, %v1879_v42  ;;  %v1952_v48 = vor.u32 %v2322_v46, %v1951_v45  ;;  %v1815_v49 = vld [vmem:[%s3373_s3 + $0xc0] sm:$0xf]  ;;  %v2288_v50 = vld [vmem:[%s3373_s3 + $0xc4] sm:$0xf0]  ;;  %v1871_v54 = vld [vmem:[%s3373_s3 + $0x130] sm:$0xf] }
   0xf   :  { %v1816_v51 = vor.u32 %v2288_v50, %v1815_v49  ;;  %v1735_v52 = vld [vmem:[%s3373_s3 + $0x20] sm:$0xf]  ;;  %v2268_v53 = vld [vmem:[%s3373_s3 + $0x24] sm:$0xf0]  ;;  %v2302_v56 = vld [vmem:[%s3373_s3 + $0x134] sm:$0xf0] }
  0x10   :  { %699 = vmatpush.bf16.msra.mxu1 %v1752_v31  ;;  %717 = vmatpush.bf16.msra.mxu2 %v1824_v39  ;;  %v1736_v55 = vor.u32 %v2268_v53, %v1735_v52  ;;  %v1943_v57 = vld [vmem:[%s3373_s3 + $0x1c0] sm:$0xf]  ;;  %v2320_v58 = vld [vmem:[%s3373_s3 + $0x1c4] sm:$0xf0]  ;;  %v1872_v59 = vor.u32 %v2302_v56, %v1871_v54  ;;  %v1807_v61 = vld [vmem:[%s3373_s3 + $0xb0] sm:$0xf] }
  0x11   :  { %v1944_v60 = vor.u32 %v2320_v58, %v1943_v57  ;;  %v2286_v62 = vld [vmem:[%s3373_s3 + $0xb4] sm:$0xf0]  ;;  %v1727_v63 = vld [vmem:[%s3373_s3 + $0x10] sm:$0xf]  ;;  %v1863_v2 = vld [vmem:[%s3373_s3 + $0x120] sm:$0xf] }
  0x12   :  { %737 = vmatpush.bf16.msra.mxu3 %v1880_v47  ;;  %755 = vmatpush.bf16.msrb.mxu0 %v1952_v48  ;;  %v1808_v0 = vor.u32 %v2286_v62, %v1807_v61  ;;  %v2266_v1 = vld [vmem:[%s3373_s3 + $0x14] sm:$0xf0]  ;;  %v2300_v3 = vld [vmem:[%s3373_s3 + $0x124] sm:$0xf0]  ;;  %v1935_v6 = vld [vmem:[%s3373_s3 + $0x1b0] sm:$0xf] }
  0x13   :  { %v1728_v4 = vor.u32 %v2266_v1, %v1727_v63  ;;  %v1864_v5 = vor.u32 %v2300_v3, %v1863_v2  ;;  %v2318_v7 = vld [vmem:[%s3373_s3 + $0x1b4] sm:$0xf0]  ;;  %v1799_v9 = vld [vmem:[%s3373_s3 + $0xa0] sm:$0xf]  ;;  %v2284_v10 = vld [vmem:[%s3373_s3 + $0xa4] sm:$0xf0] }
  0x14   :  { %700 = vmatpush.bf16.msra.mxu1 %v1744_v43  ;;  %718 = vmatpush.bf16.msra.mxu2 %v1816_v51  ;;  %v1936_v8 = vor.u32 %v2318_v7, %v1935_v6  ;;  %v1800_v11 = vor.u32 %v2284_v10, %v1799_v9  ;;  %v1719_v12 = vld [vmem:[%s3373_s3] sm:$0xf]  ;;  %v2264_v13 = vld [vmem:[%s3373_s3 + $0x4] sm:$0xf0]  ;;  %v1855_v14 = vld [vmem:[%s3373_s3 + $0x110] sm:$0xf] }
  0x15   :  { %v1720_v15 = vor.u32 %v2264_v13, %v1719_v12  ;;  %v2298_v16 = vld [vmem:[%s3373_s3 + $0x114] sm:$0xf0]  ;;  %v1927_v17 = vld [vmem:[%s3373_s3 + $0x1a0] sm:$0xf]  ;;  %v2316_v18 = vld [vmem:[%s3373_s3 + $0x1a4] sm:$0xf0] }
  0x16   :  { %1716 = vmatmul.msk.bf16.gmra.mxu0 %vm53_vm1, %v2262_v24  ;;  %738 = vmatpush.bf16.msra.mxu3 %v1872_v59  ;;  %v1856_v19 = vor.u32 %v2298_v16, %v1855_v14  ;;  %v1928_v20 = vor.u32 %v2316_v18, %v1927_v17  ;;  %v1791_v21 = vld [vmem:[%s3373_s3 + $0x90] sm:$0xf]  ;;  %v2282_v22 = vld [vmem:[%s3373_s3 + $0x94] sm:$0xf0]  ;;  %v1847_v24 = vld [vmem:[%s3373_s3 + $0x100] sm:$0xf] }
  0x17   :  { %756 = vmatpush.bf16.msrb.mxu0 %v1944_v60  ;;  %v1792_v23 = vor.u32 %v2282_v22, %v1791_v21  ;;  %v2296_v25 = vld [vmem:[%s3373_s3 + $0x104] sm:$0xf0]  ;;  %v1919_v26 = vld [vmem:[%s3373_s3 + $0x190] sm:$0xf]  ;;  %v2314_v28 = vld [vmem:[%s3373_s3 + $0x194] sm:$0xf0] }
  0x18   :  { %701 = vmatpush.bf16.msra.mxu1 %v1736_v55  ;;  %719 = vmatpush.bf16.msra.mxu2 %v1808_v0  ;;  %v1848_v27 = vor.u32 %v2296_v25, %v1847_v24  ;;  %v2031_v29 = vld [vmem:[%s3373_s3 + $0x270] sm:$0xf]  ;;  %v2342_v30 = vld [vmem:[%s3373_s3 + $0x274] sm:$0xf0]  ;;  %v1920_v31 = vor.u32 %v2314_v28, %v1919_v26  ;;  %v1783_v33 = vld [vmem:[%s3373_s3 + $0x80] sm:$0xf] }
  0x19   :  { %v2032_v32 = vor.u32 %v2342_v30, %v2031_v29  ;;  %v2280_v34 = vld [vmem:[%s3373_s3 + $0x84] sm:$0xf0]  ;;  %v1911_v36 = vld [vmem:[%s3373_s3 + $0x180] sm:$0xf]  ;;  %v2293_v41 = vld [vmem:[%s3373_s3 + $0xf4] sm:$0xf] }
  0x1a   :  { %739 = vmatpush.bf16.msra.mxu3 %v1864_v5  ;;  %v1784_v35 = vor.u32 %v2280_v34, %v1783_v33  ;;  %v2312_v37 = vld [vmem:[%s3373_s3 + $0x184] sm:$0xf0]  ;;  %v2023_v39 = vld [vmem:[%s3373_s3 + $0x260] sm:$0xf]  ;;  %v1841_v43 = vld [vmem:[%s3373_s3 + $0xf8] sm:$0xf0] }
  0x1b   :  { %757 = vmatpush.bf16.msrb.mxu0 %v1936_v8  ;;  %v1912_v38 = vor.u32 %v2312_v37, %v1911_v36  ;;  %v2340_v40 = vld [vmem:[%s3373_s3 + $0x264] sm:$0xf0]  ;;  %v1844_v44 = vor.u32 %v2293_v41, %v1841_v43  ;;  %v2277_v45 = vld [vmem:[%s3373_s3 + $0x74] sm:$0xf]  ;;  %v1777_v46 = vld [vmem:[%s3373_s3 + $0x78] sm:$0xf0] }
  0x1c   :  { %702 = vmatpush.bf16.msra.mxu1 %v1728_v4  ;;  %720 = vmatpush.bf16.msra.mxu2 %v1800_v11  ;;  %v2024_v42 = vor.u32 %v2340_v40, %v2023_v39  ;;  %v2710_v47 = vld [vmem:[%s3372_s2] ss:$0 sm:$0xff]  ;;  %v1780_v48 = vor.u32 %v2277_v45, %v1777_v46  ;;  %v2015_v49 = vld [vmem:[%s3373_s3 + $0x250] sm:$0xf]  ;;  %v2338_v50 = vld [vmem:[%s3373_s3 + $0x254] sm:$0xf0] }
  0x1d   :  { %v2291_v51 = vld [vmem:[%s3373_s3 + $0xe4] sm:$0xf]  ;;  %v2016_v52 = vor.u32 %v2338_v50, %v2015_v49  ;;  %v1833_v53 = vld [vmem:[%s3373_s3 + $0xe8] sm:$0xf0]  ;;  %v2309_v54 = vld [vmem:[%s3373_s3 + $0x174] sm:$0xf] }
  0x1e   :  { %740 = vmatpush.bf16.msra.mxu3 %v1856_v19  ;;  %v1905_v55 = vld [vmem:[%s3373_s3 + $0x178] sm:$0xf0]  ;;  %v1836_v56 = vor.u32 %v2291_v51, %v1833_v53  ;;  %v2275_v59 = vld [vmem:[%s3373_s3 + $0x64] sm:$0xf]  ;;  %v1769_v60 = vld [vmem:[%s3373_s3 + $0x68] sm:$0xf0] }
  0x1f   :  { %758 = vmatpush.bf16.msrb.mxu0 %v1928_v20  ;;  %v1908_v57 = vor.u32 %v2309_v54, %v1905_v55  ;;  %v1772_v62 = vor.u32 %v2275_v59, %v1769_v60  ;;  %v2007_v63 = vld [vmem:[%s3373_s3 + $0x240] sm:$0xf]  ;;  %v2336_v0 = vld [vmem:[%s3373_s3 + $0x244] sm:$0xf0]  ;;  %v2289_v1 = vld [vmem:[%s3373_s3 + $0xd4] sm:$0xf] }
  0x20   :  { %703 = vmatpush.bf16.msra.mxu1 %v1720_v15  ;;  %721 = vmatpush.bf16.msra.mxu2 %v1792_v23  ;;  %v2008_v2 = vor.u32 %v2336_v0, %v2007_v63  ;;  %v1825_v3 = vld [vmem:[%s3373_s3 + $0xd8] sm:$0xf0]  ;;  %v2307_v4 = vld [vmem:[%s3373_s3 + $0x164] sm:$0xf]  ;;  %v1897_v5 = vld [vmem:[%s3373_s3 + $0x168] sm:$0xf0] }
  0x21   :  { %v1828_v7 = vor.u32 %v2289_v1, %v1825_v3  ;;  %v1900_v8 = vor.u32 %v2307_v4, %v1897_v5  ;;  %v2273_v9 = vld [vmem:[%s3373_s3 + $0x54] sm:$0xf]  ;;  %v1761_v10 = vld [vmem:[%s3373_s3 + $0x58] sm:$0xf0]  ;;  %v1999_v13 = vld [vmem:[%s3373_s3 + $0x230] sm:$0xf] }
  0x22   :  { %741 = vmatpush.bf16.msra.mxu3 %v1848_v27  ;;  %v1764_v12 = vor.u32 %v2273_v9, %v1761_v10  ;;  %v2334_v14 = vld [vmem:[%s3373_s3 + $0x234] sm:$0xf0]  ;;  %v2287_v15 = vld [vmem:[%s3373_s3 + $0xc4] sm:$0xf]  ;;  %v1817_v17 = vld [vmem:[%s3373_s3 + $0xc8] sm:$0xf0] }
  0x23   :  { %759 = vmatpush.bf16.msrb.mxu0 %v1920_v31  ;;  %v2000_v16 = vor.u32 %v2334_v14, %v1999_v13  ;;  %v2305_v18 = vld [vmem:[%s3373_s3 + $0x154] sm:$0xf]  ;;  %v1889_v19 = vld [vmem:[%s3373_s3 + $0x158] sm:$0xf0]  ;;  %v1820_v21 = vor.u32 %v2287_v15, %v1817_v17  ;;  %v2271_v23 = vld [vmem:[%s3373_s3 + $0x44] sm:$0xf] }
  0x24   :  { %772 = vmatpush.bf16.msrb.mxu1 %v2032_v32  ;;  %722 = vmatpush.bf16.msra.mxu2 %v1784_v35  ;;  %v1892_v22 = vor.u32 %v2305_v18, %v1889_v19  ;;  %v1753_v24 = vld [vmem:[%s3373_s3 + $0x48] sm:$0xf0]  ;;  %vm118_vm3 = vsmask.f32 256  ;;  %v1991_v29 = vld [vmem:[%s3373_s3 + $0x220] sm:$0xf] }
  0x25   :  { %v1756_v26 = vor.u32 %v2271_v23, %v1753_v24  ;;  %v2332_v30 = vld [vmem:[%s3373_s3 + $0x224] sm:$0xf0]  ;;  %v2285_v31 = vld [vmem:[%s3373_s3 + $0xb4] sm:$0xf]  ;;  %v1809_v33 = vld [vmem:[%s3373_s3 + $0xb8] sm:$0xf0] }
  0x26   :  { %810 = vmatpush.bf16.msrb.mxu3 %v1844_v44  ;;  %v1992_v32 = vor.u32 %v2332_v30, %v1991_v29  ;;  %v2303_v34 = vld [vmem:[%s3373_s3 + $0x144] sm:$0xf]  ;;  %v1881_v35 = vld [vmem:[%s3373_s3 + $0x148] sm:$0xf0]  ;;  %vm138_vm4 = vsmask.f32 1280  ;;  %v1812_v37 = vor.u32 %v2285_v31, %v1809_v33  ;;  %vm2813_vm5 = vmand %vm117_vm2, %vm118_vm3 }
  0x27   :  { %760 = vmatpush.bf16.msrb.mxu0 %v1912_v38  ;;  %v1884_v38 = vor.u32 %v2303_v34, %v1881_v35  ;;  %vm137_vm6 = vcmask 1041408   ;;  %v2269_v41 = vld [vmem:[%s3373_s3 + $0x34] sm:$0xf]  ;;  %v1983_v45 = vld [vmem:[%s3373_s3 + $0x210] sm:$0xf]  ;;  %vm171_vm8 = vcmask 1046528  }
  0x28   :  { %773 = vmatpush.bf16.msrb.mxu1 %v2024_v42  ;;  %791 = vmatpush.bf16.msrb.mxu2 %v1780_v48  ;;  %v1745_v42 = vld [vmem:[%s3373_s3 + $0x38] sm:$0xf0]  ;;  %v2330_v46 = vld [vmem:[%s3373_s3 + $0x214] sm:$0xf0]  ;;  %v2283_v48 = vld [vmem:[%s3373_s3 + $0xa4] sm:$0xf] }
  0x29   :  { %v1748_v44 = vor.u32 %v2269_v41, %v1745_v42  ;;  %v1984_v49 = vor.u32 %v2330_v46, %v1983_v45  ;;  %v1801_v50 = vld [vmem:[%s3373_s3 + $0xa8] sm:$0xf0]  ;;  %v2301_v51 = vld [vmem:[%s3373_s3 + $0x134] sm:$0xf]  ;;  %v1793_v63 = vld [vmem:[%s3373_s3 + $0x98] sm:$0xf0] }
  0x2a   :  { %811 = vmatpush.bf16.msrb.mxu3 %v1836_v56  ;;  %v1804_v54 = vor.u32 %v2283_v48, %v1801_v50  ;;  %v2267_v56 = vld [vmem:[%s3373_s3 + $0x24] sm:$0xf]  ;;  %v1865_v4 = vld [vmem:[%s3373_s3 + $0x128] sm:$0xf0]  ;;  %v2265_v5 = vld [vmem:[%s3373_s3 + $0x14] sm:$0xf] }
  0x2b   :  { %829 = vmatpush.bf16.msra.mxu0 %v1908_v57  ;;  %v1737_v57 = vld [vmem:[%s3373_s3 + $0x28] sm:$0xf0]  ;;  %v2299_v3 = vld [vmem:[%s3373_s3 + $0x124] sm:$0xf]  ;;  %v1729_v9 = vld [vmem:[%s3373_s3 + $0x18] sm:$0xf0] }
  0x2c   :  { %774 = vmatpush.bf16.msrb.mxu1 %v2016_v52  ;;  %792 = vmatpush.bf16.msrb.mxu2 %v1772_v62  ;;  %v1873_v52 = vld [vmem:[%s3373_s3 + $0x138] sm:$0xf0]  ;;  %v1740_v60 = vor.u32 %v2267_v56, %v1737_v57  ;;  %v2281_v62 = vld [vmem:[%s3373_s3 + $0x94] sm:$0xf]  ;;  %vm2875_vm7 = vmand %vm137_vm6, %vm138_vm4  ;;  %vm142_vm9 = vsmask.f32 7424  ;;  %v1732_v17 = vor.u32 %v2265_v5, %v1729_v9 }
  0x2d   :  { %v1876_v55 = vor.u32 %v2301_v51, %v1873_v52  ;;  %vm180_vm10 = vsmask.f32 6400  ;;  %v2279_v24 = vld [vmem:[%s3373_s3 + $0x84] sm:$0xf]  ;;  %v1785_v29 = vld [vmem:[%s3373_s3 + $0x88] sm:$0xf0] }
  0x2e   :  { %812 = vmatpush.bf16.msrb.mxu3 %v1828_v7  ;;  %v1796_v7 = vor.u32 %v2281_v62, %v1793_v63  ;;  %v2297_v34 = vld [vmem:[%s3373_s3 + $0x114] sm:$0xf]  ;;  %v1788_v48 = vor.u32 %v2279_v24, %v1785_v29  ;;  %v1721_v50 = vld [vmem:[%s3373_s3 + $0x8] sm:$0xf0]  ;;  %v2323_v57 = vld [vmem:[%s3373_s3 + $0x1e4] sm:$0xf] }
  0x2f   :  { %830 = vmatpush.bf16.msra.mxu0 %v1900_v8  ;;  %v1868_v8 = vor.u32 %v2299_v3, %v1865_v4  ;;  %v1849_v56 = vld [vmem:[%s3373_s3 + $0x108] sm:$0xf0]  ;;  %v2339_v5 = vld [vmem:[%s3373_s3 + $0x264] sm:$0xf]  ;;  %vm201_vm11 = vcmask 1045504   ;;  %vm1624_vm12 = vcmask 1041409  }
  0x30   :  { %775 = vmatpush.bf16.msrb.mxu1 %v2008_v2  ;;  %793 = vmatpush.bf16.msrb.mxu2 %v1764_v12  ;;  %v1945_v24 = vld [vmem:[%s3373_s3 + $0x1c8] sm:$0xf0]  ;;  %s2429_s17 = smov [#allocation2]   ;;  %s1698_s20 = sshll.u32 %s3379_s9, 4  ;;  %vm1689_vm13 = vcmask 9216   ;;  %s1699_s20 = int_to_ptr.hbm [resolvable:$true] %s1698_s20 }
  0x31   :  { %s1696_s18 = sshll.u32 %s2429_s17, 4  ;;  %s1697_s18 = int_to_ptr.vmem [resolvable:$true] %s1696_s18 }
  0x32   :  { %813 = vmatpush.bf16.msrb.mxu3 %v1820_v21 }
  0x33   :  { %831 = vmatpush.bf16.msra.mxu0 %v1892_v22 }
  0x34   :  { %776 = vmatpush.bf16.msrb.mxu1 %v2000_v16  ;;  %794 = vmatpush.bf16.msrb.mxu2 %v1756_v26 }
  0x36   :  { %814 = vmatpush.bf16.msrb.mxu3 %v1812_v37 }
  0x37   :  { %832 = vmatpush.bf16.msra.mxu0 %v1884_v38  ;;  %v1857_v38 = vld [vmem:[%s3373_s3 + $0x118] sm:$0xf0] }
  0x38   :  { %777 = vmatpush.bf16.msrb.mxu1 %v1992_v32  ;;  %795 = vmatpush.bf16.msrb.mxu2 %v1748_v44 }
  0x3a   :  { %815 = vmatpush.bf16.msrb.mxu3 %v1804_v54 }
  0x3b   :  { %833 = vmatpush.bf16.msra.mxu0 %v1876_v55  ;;  %v2295_v55 = vld [vmem:[%s3373_s3 + $0x104] sm:$0xf] }
  0x3c   :  { %778 = vmatpush.bf16.msrb.mxu1 %v1984_v49  ;;  %796 = vmatpush.bf16.msrb.mxu2 %v1740_v60  ;;  %v2263_v49 = vld [vmem:[%s3373_s3 + $0x4] sm:$0xf]  ;;  %v2341_v60 = vld [vmem:[%s3373_s3 + $0x274] sm:$0xf] }
  0x3d   :  { %v1724_v63 = vor.u32 %v2263_v49, %v1721_v50 }
  0x3e   :  { %816 = vmatpush.bf16.msrb.mxu3 %v1796_v7  ;;  %v1953_v7 = vld [vmem:[%s3373_s3 + $0x1d8] sm:$0xf0] }
  0x3f   :  { %834 = vmatpush.bf16.msra.mxu0 %v1868_v8  ;;  %v2025_v8 = vld [vmem:[%s3373_s3 + $0x268] sm:$0xf0] }
  0x40   :  { %797 = vmatpush.bf16.msrb.mxu2 %v1732_v17 }
  0x42   :  { %817 = vmatpush.bf16.msrb.mxu3 %v1788_v48 }
  0x44   :  { %798 = vmatpush.bf16.msrb.mxu2 %v1724_v63  ;;  %v2313_v63 = vld [vmem:[%s3373_s3 + $0x194] sm:$0xf] }
  0x83   :  { %v73_v58 = vpop.f32.mrf.mxu0 }
  0x84   :  { %v74_v61 = vadd.f32 %v2710_v47, %v73_v58  ;;  %v1975_v58 = vld [vmem:[%s3373_s3 + $0x200] sm:$0xf] }
  0x86   :  { %v83_v6 = vmax.f32 %v74_v61, 0.0  ;;  %v2328_v61 = vld [vmem:[%s3373_s3 + $0x204] sm:$0xf0] }
  0x88   :  { %v2761_v11 = vpack.c.bf16 %v83_v6, %v83_v6  ;;  %v1976_v6 = vor.u32 %v2328_v61, %v1975_v58  ;;  %v2033_v61 = vld [vmem:[%s3373_s3 + $0x278] sm:$0xf0] }
  0x89   :  { %v2036_v4 = vor.u32 %v2341_v60, %v2033_v61  ;;  %v2331_v61 = vld [vmem:[%s3373_s3 + $0x224] sm:$0xf] }
  0x8a   :  { %v2782_v20 = vunpack.c.l.b16 %v2761_v11  ;;  %779 = vmatpush.bf16.msrb.mxu1 %v1976_v6  ;;  %v2321_v6 = vld [vmem:[%s3373_s3 + $0x1d4] sm:$0xf] }
  0x8b   :  { %v75_v25 = vpop.f32.mrf.mxu0 }
  0x8c   :  { %v95_v27 = vpack.c.b16 %v2782_v20, %v2782_v20  ;;  %v76_v28 = vadd.f32 %v2710_v47, %v75_v25 }
  0x8e   :  { %v84_v36 = vmax.f32 %v76_v28, 0.0  ;;  %v97_v39 = vrot.slane %v95_v27, 1 }
  0x90   :  { %v88_v43 = vpack.c.bf16 %v84_v36, %v84_v36  ;;  %v120_v16 = vsel %vm2813_vm5, %v97_v39, %v2761_v11  ;;  %v2325_v39 = vld [vmem:[%s3373_s3 + $0x1f4] sm:$0xf] }
  0x92   :  { %v103_v53 = vunpack.c.l.b16 %v88_v43 }
  0x93   :  { %v78_v59 = vpop.f32.mrf.mxu0 }
  0x94   :  { %v105_v0 = vpack.c.b16 %v103_v53, %v2782_v20  ;;  %v109_v1 = vpack.c.b16 %v103_v53, %v103_v53  ;;  %v79_v2 = vadd.f32 %v2710_v47, %v78_v59  ;;  %v1860_v53 = vor.u32 %v2297_v34, %v1857_v38  ;;  %v1961_v59 = vld [vmem:[%s3373_s3 + $0x1e8] sm:$0xf0] }
  0x95   :  { %v1964_v3 = vor.u32 %v2323_v57, %v1961_v59  ;;  %v2333_v57 = vld [vmem:[%s3373_s3 + $0x234] sm:$0xf] }
  0x96   :  { %v107_v10 = vrot.slane %v105_v0, 7  ;;  %v111_v12 = vrot.slane %v109_v1, 2  ;;  %v113_v13 = vrot.slane %v109_v1, 1  ;;  %v85_v14 = vmax.f32 %v79_v2, 0.0  ;;  %835 = vmatpush.bf16.msra.mxu0 %v1860_v53 }
  0x97   :  { %v1852_v0 = vor.u32 %v2295_v55, %v1849_v56  ;;  %v1929_v55 = vld [vmem:[%s3373_s3 + $0x1a8] sm:$0xf0] }
  0x98   :  { %v132_v18 = vsel %vm117_vm2, %v107_v10, %v111_v12  ;;  %v2883_v19 = vpack.c.bf16 %v85_v14, %v85_v14  ;;  %v2886_v20 = vsel %vm117_vm2, %v120_v16, %v107_v10  ;;  %v2028_v12 = vor.u32 %v2339_v5, %v2025_v8  ;;  %v2017_v14 = vld [vmem:[%s3373_s3 + $0x258] sm:$0xf0]  ;;  %v2311_v8 = vld [vmem:[%s3373_s3 + $0x184] sm:$0xf] }
  0x99   :  { %704 = vmatmul.bf16.vlgmr.msra.gmra.mxu1 %v2886_v20  ;;  %v2891_v21 = vsel %vm2875_vm7, %v132_v18, %v113_v13  ;;  %v172_v11 = vrot.slane %v2886_v20, 1  ;;  %v143_v22 = vshrl.u32 %v2886_v20, 16  ;;  %v145_v23 = vshll.u32 %v2886_v20, 16  ;;  %v2337_v13 = vld [vmem:[%s3373_s3 + $0x254] sm:$0xf] }
  0x9a   :  { %v2900_v25 = vunpack.c.l.b16 %v2883_v19  ;;  %v173_v26 = vrot.slane %v2891_v21, 1  ;;  %v150_v27 = vshll.u32 %v2891_v21, 16  ;;  %v184_v28 = vshrl.u32 %v2891_v21, 16  ;;  %836 = vmatpush.bf16.msra.mxu0 %v1852_v0  ;;  %v1921_v0 = vld [vmem:[%s3373_s3 + $0x198] sm:$0xf0] }
  0x9b   :  { %v80_v30 = vpop.f32.mrf.mxu0  ;;  %v147_v31 = vrot.slane %v145_v23, 1  ;;  %v181_v32 = vrot.slane %v143_v22, 1  ;;  %v182_v33 = vrot.slane %v145_v23, 2  ;;  %v2319_v23 = vld [vmem:[%s3373_s3 + $0x1c4] sm:$0xf]  ;;  %v1924_v5 = vor.u32 %v2313_v63, %v1921_v0  ;;  %v2354_v63 = vld [vmem:[%s3375_s5 + $0x58] sm:$0xff] }
  0x9c   :  { %v81_v35 = vadd.f32 %v2710_v47, %v80_v30  ;;  %v2913_v36 = vsel %vm171_vm8, %v172_v11, %v173_v26  ;;  %v152_v37 = vrot.slane %v150_v27, 1  ;;  %v186_v43 = vrot.slane %v184_v28, 1  ;;  %v1969_v47 = vld [vmem:[%s3373_s3 + $0x1f8] sm:$0xf0] }
  0x9d   :  { %742 = vmatmul.bf16.vlgmr.msra.gmra.mxu3 %v2913_v36  ;;  %v148_v41 = vor.u32 %v147_v31, %v143_v22  ;;  %v183_v42 = vor.u32 %v182_v33, %v181_v32  ;;  %v187_v44 = vrot.slane %v150_v27, 2  ;;  %v96_v45 = vpack.c.b16 %v2900_v25, %v2900_v25  ;;  %v2317_v31 = vld [vmem:[%s3373_s3 + $0x1b4] sm:$0xf] }
  0x9e   :  { %v86_v46 = vmax.f32 %v81_v35, 0.0  ;;  %v1972_v54 = vor.u32 %v2325_v39, %v1969_v47  ;;  %v1956_v11 = vor.u32 %v2321_v6, %v1953_v7  ;;  %v2020_v27 = vor.u32 %v2337_v13, %v2017_v14  ;;  %v1937_v35 = vld [vmem:[%s3373_s3 + $0x1b8] sm:$0xf0]  ;;  %v2329_v6 = vld [vmem:[%s3373_s3 + $0x214] sm:$0xf] }
  0x9f   :  { %v2934_v51 = vsel %vm142_vm9, %v148_v41, %v152_v37  ;;  %v188_v52 = vor.u32 %v187_v44, %v186_v43  ;;  %v98_v1 = vrot.slane %v96_v45, 1  ;;  %v1948_v15 = vor.u32 %v2319_v23, %v1945_v24  ;;  %v2335_v41 = vld [vmem:[%s3373_s3 + $0x244] sm:$0xf]  ;;  %v2009_v45 = vld [vmem:[%s3373_s3 + $0x248] sm:$0xf0] }
  0xa0   :  { %v90_v58 = vpack.c.bf16 %v86_v46, %v86_v46  ;;  %723 = vmatmul.bf16.vlgmr.msra.gmra.mxu2 %v2934_v51  ;;  %848 = vmatpush.bf16.msra.mxu1 %v1972_v54  ;;  %v1940_v50 = vor.u32 %v2317_v31, %v1937_v35  ;;  %v2315_v54 = vld [vmem:[%s3373_s3 + $0x1a4] sm:$0xf]  ;;  %v1985_v7 = vld [vmem:[%s3373_s3 + $0x218] sm:$0xf0]  ;;  %v1977_v14 = vld [vmem:[%s3373_s3 + $0x208] sm:$0xf0] }
  0xa1   :  { %v2956_v62 = vsel %vm180_vm10, %v183_v42, %v188_v52  ;;  %867 = vmatpush.bf16.msra.mxu2 %v2036_v4  ;;  %v121_v22 = vsel %vm2813_vm5, %v98_v1, %v2883_v19  ;;  %v2012_v52 = vor.u32 %v2335_v41, %v2009_v45  ;;  %v1932_v60 = vor.u32 %v2315_v54, %v1929_v55  ;;  %v1993_v1 = vld [vmem:[%s3373_s3 + $0x228] sm:$0xf0]  ;;  %v2327_v13 = vld [vmem:[%s3373_s3 + $0x204] sm:$0xf]  ;;  %v2349_v41 = vld [vmem:[%s3375_s5 + $0x30] sm:$0xff] }
  0xa2   :  { %v104_v2 = vunpack.c.l.b16 %v90_v58  ;;  %761 = vmatmul.bf16.vlgmr.msrb.gmra.mxu0 %v2956_v62  ;;  %v2001_v58 = vld [vmem:[%s3373_s3 + $0x238] sm:$0xf0]  ;;  %v1996_v4 = vor.u32 %v2331_v61, %v1993_v1  ;;  %v2373_v54 = vld [vmem:[%s3375_s5 + $0xf0] sm:$0xff]  ;;  %v2347_v55 = vld [vmem:[%s3375_s5 + $0x20] sm:$0xff] }
  0xa3   :  { %v2004_v59 = vor.u32 %v2333_v57, %v2001_v58  ;;  %v2366_v45 = vld [vmem:[%s3375_s5 + $0xb8] sm:$0xff]  ;;  %v2363_v1 = vld [vmem:[%s3375_s5 + $0xa0] sm:$0xff] }
  0xa4   :  { %v106_v9 = vpack.c.b16 %v104_v2, %v2900_v25  ;;  %v110_v10 = vpack.c.b16 %v104_v2, %v104_v2  ;;  %849 = vmatpush.bf16.msra.mxu1 %v1964_v3  ;;  %v202_v2 = vrot.slane %v2886_v20, 2  ;;  %v203_v3 = vrot.slane %v2891_v21, 2  ;;  %v1913_v21 = vld [vmem:[%s3373_s3 + $0x188] sm:$0xf0]  ;;  %v2346_v61 = vld [vmem:[%s3375_s5 + $0x18] sm:$0xff] }
  0xa5   :  { %868 = vmatpush.bf16.msra.mxu2 %v2028_v12  ;;  %v1916_v12 = vor.u32 %v2311_v8, %v1913_v21  ;;  %v2370_v8 = vld [vmem:[%s3375_s5 + $0xd8] sm:$0xff] }
  0xa6   :  { %v108_v16 = vrot.slane %v106_v9, 7  ;;  %v112_v17 = vrot.slane %v110_v10, 2  ;;  %v114_v18 = vrot.slane %v110_v10, 1  ;;  %v204_v9 = vsel %vm201_vm11, %v202_v2, %v203_v3  ;;  %v2371_v2 = vld [vmem:[%s3375_s5 + $0xe0] sm:$0xff] }
  0xa7   :  { %v1988_v10 = vor.u32 %v2329_v6, %v1985_v7  ;;  %v2362_v7 = vld [vmem:[%s3375_s5 + $0x98] sm:$0xff] }
  0xa8   :  { %v135_v25 = vsel %vm117_vm2, %v108_v16, %v112_v17  ;;  %v2989_v26 = vsel %vm117_vm2, %v121_v22, %v108_v16  ;;  %850 = vmatpush.bf16.msra.mxu1 %v1956_v11  ;;  %v1980_v16 = vor.u32 %v2327_v13, %v1977_v14 }
  0xa9   :  { %709 = vmatmul.bf16.gmra.mxu1 %v2989_v26  ;;  %v2994_v19 = vsel %vm2875_vm7, %v135_v25, %v114_v18  ;;  %v175_v28 = vrot.slane %v2989_v26, 1  ;;  %v154_v29 = vshrl.u32 %v2989_v26, 16  ;;  %v156_v30 = vshll.u32 %v2989_v26, 16  ;;  %869 = vmatpush.bf16.msra.mxu2 %v2020_v27 }
  0xaa   :  { %v176_v32 = vrot.slane %v2994_v19, 1  ;;  %v161_v33 = vshll.u32 %v2994_v19, 16  ;;  %v193_v34 = vshrl.u32 %v2994_v19, 16  ;;  %v205_v17 = vrot.slane %v2989_v26, 2 }
  0xab   :  { %v158_v37 = vrot.slane %v156_v30, 1  ;;  %v190_v38 = vrot.slane %v154_v29, 1  ;;  %v191_v39 = vrot.slane %v156_v30, 2  ;;  %v206_v18 = vrot.slane %v2994_v19, 2 }
  0xac   :  { %v177_v42 = vsel %vm171_vm8, %v175_v28, %v176_v32  ;;  %v163_v43 = vrot.slane %v161_v33, 1  ;;  %v195_v44 = vrot.slane %v193_v34, 1  ;;  %v196_v47 = vrot.slane %v161_v33, 2  ;;  %851 = vmatpush.bf16.msra.mxu1 %v1948_v15 }
  0xad   :  { %747 = vmatmul.bf16.gmra.mxu3 %v177_v42  ;;  %v159_v46 = vor.u32 %v158_v37, %v154_v29  ;;  %v192_v48 = vor.u32 %v191_v39, %v190_v38  ;;  %870 = vmatpush.bf16.msra.mxu2 %v2012_v52  ;;  %v207_v11 = vsel %vm201_vm11, %v205_v17, %v206_v18  ;;  %v2350_v37 = vld [vmem:[%s3375_s5 + $0x38] sm:$0xff]  ;;  %v2369_v17 = vld [vmem:[%s3375_s5 + $0xd0] sm:$0xff]  ;;  %v2343_v18 = vld [vmem:[%s3375_s5] sm:$0xff] }
  0xae   :  { %v197_v49 = vor.u32 %v196_v47, %v195_v44  ;;  %v2358_v38 = vld [vmem:[%s3375_s5 + $0x78] sm:$0xff]  ;;  %1466 = vmatpush.bf16.msra.mxu3 %v2350_v37 }
  0xaf   :  { %v164_v53 = vsel %vm142_vm9, %v159_v46, %v163_v43  ;;  %1485 = vmatpush.bf16.msrb.mxu0 %v2358_v38  ;;  %v2374_v46 = vld [vmem:[%s3375_s5 + $0xf8] sm:$0xff] }
  0xb0   :  { %728 = vmatmul.bf16.gmra.mxu2 %v164_v53  ;;  %v198_v56 = vsel %vm180_vm10, %v192_v48, %v197_v49  ;;  %852 = vmatpush.bf16.msra.mxu1 %v1940_v50  ;;  %v2348_v48 = vld [vmem:[%s3375_s5 + $0x28] sm:$0xff]  ;;  %v2382_v37 = vld [vmem:[%s3375_s5 + $0x138] sm:$0xff] }
  0xb1   :  { %871 = vmatpush.bf16.msra.mxu2 %v2004_v59  ;;  %v2356_v49 = vld [vmem:[%s3375_s5 + $0x68] sm:$0xff] }
  0xb2   :  { %766 = vmatmul.bf16.gmra.mxu0 %v198_v56  ;;  %1467 = vmatpush.bf16.msra.mxu3 %v2349_v41  ;;  %v2364_v59 = vld [vmem:[%s3375_s5 + $0xa8] sm:$0xff] }
  0xb4   :  { %853 = vmatpush.bf16.msra.mxu1 %v1932_v60  ;;  %v2372_v60 = vld [vmem:[%s3375_s5 + $0xe8] sm:$0xff] }
  0xb5   :  { %872 = vmatpush.bf16.msra.mxu2 %v1996_v4  ;;  %v2345_v4 = vld [vmem:[%s3375_s5 + $0x10] sm:$0xff] }
  0xb6   :  { %1468 = vmatpush.bf16.msra.mxu3 %v2348_v48  ;;  %v2367_v48 = vld [vmem:[%s3375_s5 + $0xc0] sm:$0xff] }
  0xb8   :  { %854 = vmatpush.bf16.msra.mxu1 %v1924_v5  ;;  %v2353_v5 = vld [vmem:[%s3375_s5 + $0x50] sm:$0xff] }
  0xb9   :  { %780 = vmatmul.bf16.vlgmr.msrb.gmra.mxu1 %v204_v9  ;;  %873 = vmatpush.bf16.msra.mxu2 %v1988_v10  ;;  %v2352_v10 = vld [vmem:[%s3375_s5 + $0x48] sm:$0xff] }
  0xba   :  { %1469 = vmatpush.bf16.msra.mxu3 %v2347_v55 }
  0xbc   :  { %855 = vmatpush.bf16.msra.mxu1 %v1916_v12 }
  0xbd   :  { %818 = vmatmul.bf16.vlgmr.msrb.gmra.mxu3 %v2934_v51  ;;  %874 = vmatpush.bf16.msra.mxu2 %v1980_v16  ;;  %v2361_v16 = vld [vmem:[%s3375_s5 + $0x90] sm:$0xff] }
  0xbe   :  { %1470 = vmatpush.bf16.msra.mxu3 %v2346_v61 }
  0xc0   :  { %799 = vmatmul.bf16.vlgmr.msrb.gmra.mxu2 %v2886_v20  ;;  %1504 = vmatpush.bf16.msrb.mxu1 %v2366_v45 }
  0xc1   :  { %1523 = vmatpush.bf16.msrb.mxu2 %v2374_v46  ;;  %v2359_v46 = vld [vmem:[%s3375_s5 + $0x80] sm:$0xff] }
  0xc2   :  { %837 = vmatmul.bf16.vlgmr.msra.gmra.mxu0 %v2913_v36  ;;  %v3073_v36 = vld [vmem:[%s3374_s4] sm:$0x3]  ;;  %1471 = vmatpush.bf16.msra.mxu3 %v2345_v4 }
  0xc3   :  { %v3076_v51 = vperm.slane %v3073_v36, 0  ;;  %v3179_v6 = vperm.slane %v3073_v36, 1  ;;  %v2387_v4 = vld [vmem:[%s3375_s5 + $0x160] sm:$0xff] }
  0xc5   :  { %1524 = vmatpush.bf16.msrb.mxu2 %v2373_v54 }
  0xc9   :  { %785 = vmatmul.bf16.gmra.mxu1 %v207_v11  ;;  %1525 = vmatpush.bf16.msrb.mxu2 %v2372_v60 }
  0xcd   :  { %823 = vmatmul.bf16.gmra.mxu3 %v164_v53  ;;  %v2365_v53 = vld [vmem:[%s3375_s5 + $0xb0] sm:$0xff]  ;;  %1526 = vmatpush.bf16.msrb.mxu2 %v2371_v2 }
  0xce   :  { %1505 = vmatpush.bf16.msrb.mxu1 %v2365_v53 }
  0xd0   :  { %804 = vmatmul.bf16.gmra.mxu2 %v2989_v26 }
  0xd1   :  { %1527 = vmatpush.bf16.msrb.mxu2 %v2370_v8 }
  0xd2   :  { %842 = vmatmul.bf16.gmra.mxu0 %v177_v42  ;;  %v2357_v42 = vld [vmem:[%s3375_s5 + $0x70] sm:$0xff]  ;;  %1506 = vmatpush.bf16.msrb.mxu1 %v2364_v59 }
  0xd3   :  { %1486 = vmatpush.bf16.msrb.mxu0 %v2357_v42 }
  0xd5   :  { %1528 = vmatpush.bf16.msrb.mxu2 %v2369_v17 }
  0xd6   :  { %1507 = vmatpush.bf16.msrb.mxu1 %v2363_v1 }
  0xd7   :  { %1487 = vmatpush.bf16.msrb.mxu0 %v2356_v49 }
  0xd9   :  { %856 = vmatmul.bf16.vlgmr.msra.gmra.mxu1 %v2956_v62 }
  0xda   :  { %1508 = vmatpush.bf16.msrb.mxu1 %v2362_v7 }
  0xde   :  { %1509 = vmatpush.bf16.msrb.mxu1 %v2361_v16 }
  0xe0   :  { %875 = vmatmul.bf16.vlgmr.msra.gmra.mxu2 %v204_v9  ;;  %v2344_v9 = vld [vmem:[%s3375_s5 + $0x8] sm:$0xff] }
  0xe1   :  { %1472 = vmatpush.bf16.msra.mxu3 %v2344_v9 }
  0xe5   :  { %1473 = vmatpush.bf16.msra.mxu3 %v2343_v18 }
  0xe9   :  { %861 = vmatmul.bf16.gmra.mxu1 %v198_v56  ;;  %v2355_v56 = vld [vmem:[%s3375_s5 + $0x60] sm:$0xff]  ;;  %1542 = vmatpush.bf16.msrb.mxu3 %v2382_v37 }
  0xea   :  { %1488 = vmatpush.bf16.msrb.mxu0 %v2355_v56 }
  0xee   :  { %1489 = vmatpush.bf16.msrb.mxu0 %v2354_v63  ;;  %v2380_v63 = vld [vmem:[%s3375_s5 + $0x128] sm:$0xff] }
  0xf0   :  { %880 = vmatmul.bf16.gmra.mxu2 %v207_v11  ;;  %v2351_v11 = vld [vmem:[%s3375_s5 + $0x40] sm:$0xff] }
  0xf2   :  { %1490 = vmatpush.bf16.msrb.mxu0 %v2353_v5 }
  0xf6   :  { %1491 = vmatpush.bf16.msrb.mxu0 %v2352_v10 }
  0xfa   :  { %1492 = vmatpush.bf16.msrb.mxu0 %v2351_v11 }
 0x116   :  { %v705_v20 = vpop.f32.mrf.mxu1 }
 0x117   :  { %v706_v23 = vadd.f32 %v705_v20, %v3076_v51 }
 0x11e   :  { %v3078_v22 = vpop.f32.mrf.mxu1 }
 0x11f   :  { %v3089_v28 = vpop.f32.mrf.mxu0  ;;  %v708_v36 = vadd.f32 %v3078_v22, %v3076_v51  ;;  %v2390_v22 = vld [vmem:[%s3375_s5 + $0x178] sm:$0xff] }
 0x120   :  { %v3085_v27 = vpop.f32.mrf.mxu3  ;;  %1561 = vmatpush.bf16.msra.mxu0 %v2390_v22 }
 0x123   :  { %v724_v24 = vpop.f32.mrf.mxu2 }
 0x124   :  { %v3081_v25 = vadd.f32 %v724_v24, %v706_v23  ;;  %v2360_v24 = vld [vmem:[%s3375_s5 + $0x88] sm:$0xff] }
 0x125   :  { %1510 = vmatpush.bf16.msrb.mxu1 %v2360_v24 }
 0x126   :  { %v710_v62 = vpop.f32.mrf.mxu1  ;;  %v744_v38 = vadd.f32 %v3085_v27, %v3081_v25  ;;  %v2381_v27 = vld [vmem:[%s3375_s5 + $0x130] sm:$0xff] }
 0x127   :  { %v711_v29 = vadd.f32 %v710_v62, %v3076_v51  ;;  %v3098_v34 = vpop.f32.mrf.mxu0  ;;  %v2368_v62 = vld [vmem:[%s3375_s5 + $0xc8] sm:$0xff]  ;;  %1543 = vmatpush.bf16.msrb.mxu3 %v2381_v27 }
 0x128   :  { %v3094_v32 = vpop.f32.mrf.mxu3  ;;  %1529 = vmatpush.bf16.msrb.mxu2 %v2368_v62  ;;  %v763_v53 = vadd.f32 %v3089_v28, %v744_v38  ;;  %v2388_v28 = vld [vmem:[%s3375_s5 + $0x168] sm:$0xff]  ;;  %v2377_v62 = vld [vmem:[%s3375_s5 + $0x110] sm:$0xff] }
 0x129   :  { %1511 = vmatpush.bf16.msrb.mxu1 %v2359_v46 }
 0x12b   :  { %v3083_v26 = vpop.f32.mrf.mxu2  ;;  %1544 = vmatpush.bf16.msrb.mxu3 %v2380_v63 }
 0x12c   :  { %1530 = vmatpush.bf16.msrb.mxu2 %v2367_v48 }
 0x12e   :  { %v3087_v19 = vpop.f32.mrf.mxu1 }
 0x12f   :  { %v3118_v44 = vpop.f32.mrf.mxu0 }
 0x130   :  { %v3110_v39 = vpop.f32.mrf.mxu3 }
 0x133   :  { %v729_v30 = vpop.f32.mrf.mxu2 }
 0x134   :  { %v3092_v31 = vadd.f32 %v729_v30, %v711_v29  ;;  %v727_v29 = vadd.f32 %v3083_v26, %v708_v36 }
 0x136   :  { %v3096_v33 = vpop.f32.mrf.mxu1  ;;  %v746_v49 = vadd.f32 %v3094_v32, %v727_v29  ;;  %v749_v10 = vadd.f32 %v3110_v39, %v3092_v31 }
 0x137   :  { %v3148_v57 = vpop.f32.mrf.mxu0  ;;  %v782_v55 = vadd.f32 %v3096_v33, %v763_v53  ;;  %v713_v33 = vadd.f32 %v3087_v19, %v3076_v51 }
 0x138   :  { %v3134_v50 = vpop.f32.mrf.mxu3  ;;  %v765_v32 = vadd.f32 %v3098_v34, %v746_v49 }
 0x139   :  { %v886_v34 = vmax.f32 %v782_v55, 0.0 }
 0x13b   :  { %v3100_v15 = vpop.f32.mrf.mxu2 }
 0x13e   :  { %v3102_v35 = vpop.f32.mrf.mxu1 }
 0x13f   :  { %v838_v21 = vpop.f32.mrf.mxu0  ;;  %v784_v1 = vadd.f32 %v3102_v35, %v765_v32  ;;  %v732_v35 = vadd.f32 %v3100_v15, %v713_v33  ;;  %v2386_v15 = vld [vmem:[%s3375_s5 + $0x158] sm:$0xff] }
 0x140   :  { %v819_v3 = vpop.f32.mrf.mxu3 }
 0x141   :  { %v888_v51 = vmax.f32 %v784_v1, 0.0  ;;  %v751_v17 = vadd.f32 %v3134_v50, %v732_v35  ;;  %v2385_v50 = vld [vmem:[%s3375_s5 + $0x150] sm:$0xff] }
 0x143   :  { %v800_v43 = vpop.f32.mrf.mxu2  ;;  %v770_v38 = vadd.f32 %v3148_v57, %v751_v17  ;;  %v2376_v57 = vld [vmem:[%s3375_s5 + $0x108] sm:$0xff] }
 0x144   :  { %v801_v12 = vadd.f32 %v800_v43, %v3179_v6 }
 0x146   :  { %v3120_v47 = vpop.f32.mrf.mxu1  ;;  %v820_v20 = vadd.f32 %v819_v3, %v801_v12 }
 0x147   :  { %v840_v42 = vpop.f32.mrf.mxu0 }
 0x148   :  { %v821_v23 = vpop.f32.mrf.mxu3  ;;  %v839_v41 = vadd.f32 %v838_v21, %v820_v20 }
 0x14b   :  { %v802_v52 = vpop.f32.mrf.mxu2 }
 0x14c   :  { %v803_v30 = vadd.f32 %v802_v52, %v3179_v6  ;;  %v2389_v52 = vld [vmem:[%s3375_s5 + $0x170] sm:$0xff] }
 0x14d   :  { %1562 = vmatpush.bf16.msra.mxu0 %v2389_v52 }
 0x14e   :  { %v3150_v58 = vpop.f32.mrf.mxu1  ;;  %v822_v25 = vadd.f32 %v821_v23, %v803_v30 }
 0x14f   :  { %v843_v5 = vpop.f32.mrf.mxu0  ;;  %v789_v48 = vadd.f32 %v3150_v58, %v770_v38 }
 0x150   :  { %v824_v56 = vpop.f32.mrf.mxu3  ;;  %v841_v59 = vadd.f32 %v840_v42, %v822_v25 }
 0x151   :  { %1563 = vmatpush.bf16.msra.mxu0 %v2388_v28 }
 0x153   :  { %v3164_v0 = vpop.f32.mrf.mxu2 }
 0x154   :  { %v806_v60 = vadd.f32 %v3164_v0, %v3179_v6  ;;  %v2379_v0 = vld [vmem:[%s3375_s5 + $0x120] sm:$0xff] }
 0x155   :  { %1545 = vmatpush.bf16.msrb.mxu3 %v2379_v0  ;;  %1564 = vmatpush.bf16.msra.mxu0 %v2387_v4  ;;  %v2383_v0 = vld [vmem:[%s3375_s5 + $0x140] sm:$0xff] }
 0x156   :  { %v857_v13 = vpop.f32.mrf.mxu1  ;;  %v825_v8 = vadd.f32 %v824_v56, %v806_v60 }
 0x157   :  { %v858_v26 = vadd.f32 %v857_v13, %v839_v41  ;;  %v2378_v13 = vld [vmem:[%s3375_s5 + $0x118] sm:$0xff] }
 0x158   :  { %v844_v11 = vadd.f32 %v843_v5, %v825_v8  ;;  %v826_v20 = vpop.f32.mrf.mxu3 }
 0x159   :  { %1546 = vmatpush.bf16.msrb.mxu3 %v2378_v13  ;;  %1565 = vmatpush.bf16.msra.mxu0 %v2386_v15 }
 0x15b   :  { %v3194_v14 = vpop.f32.mrf.mxu2 }
 0x15c   :  { %v808_v12 = vadd.f32 %v3194_v14, %v3179_v6  ;;  %v768_v6 = vadd.f32 %v3118_v44, %v749_v10 }
 0x15d   :  { %1547 = vmatpush.bf16.msrb.mxu3 %v2377_v62  ;;  %1566 = vmatpush.bf16.msra.mxu0 %v2385_v50 }
 0x15e   :  { %v859_v43 = vpop.f32.mrf.mxu1  ;;  %v827_v14 = vadd.f32 %v826_v20, %v808_v12  ;;  %v787_v42 = vadd.f32 %v3120_v47, %v768_v6  ;;  %v2384_v47 = vld [vmem:[%s3375_s5 + $0x148] sm:$0xff] }
 0x15f   :  { %v860_v2 = vadd.f32 %v859_v43, %v841_v59 }
 0x161   :  { %1548 = vmatpush.bf16.msrb.mxu3 %v2376_v57  ;;  %1567 = vmatpush.bf16.msra.mxu0 %v2384_v47 }
 0x163   :  { %v876_v45 = vpop.f32.mrf.mxu2 }
 0x164   :  { %v877_v54 = vadd.f32 %v876_v45, %v858_v26  ;;  %v845_v26 = vpop.f32.mrf.mxu0 }
 0x165   :  { %v846_v27 = vadd.f32 %v845_v26, %v827_v14  ;;  %1568 = vmatpush.bf16.msra.mxu0 %v2383_v0 }
 0x166   :  { %v887_v61 = vmax.f32 %v877_v54, 0.0  ;;  %v862_v9 = vpop.f32.mrf.mxu1 }
 0x167   :  { %v863_v23 = vadd.f32 %v862_v9, %v844_v11 }
 0x168   :  { %v894_v21 = vpack.c.bf16 %v887_v61, %v886_v34 }
 0x16a   :  { %v900_v18 = vunpack.c.l.b16 %v894_v21  ;;  %v901_v31 = vunpack.c.h.b16 %v894_v21 }
 0x16b   :  { %v878_v3 = vpop.f32.mrf.mxu2 }
 0x16c   :  { %v879_v7 = vadd.f32 %v878_v3, %v860_v2  ;;  %v904_v44 = vpack.c.b16 %v900_v18, %v900_v18  ;;  %v905_v43 = vpack.c.b16 %v901_v31, %v901_v31  ;;  %v890_v2 = vmax.f32 %v787_v42, 0.0  ;;  %v2375_v3 = vld [vmem:[%s3375_s5 + $0x100] sm:$0xff] }
 0x16d   :  { %1549 = vmatpush.bf16.msrb.mxu3 %v2375_v3 }
 0x16e   :  { %v889_v19 = vmax.f32 %v879_v7, 0.0  ;;  %v864_v52 = vpop.f32.mrf.mxu1  ;;  %v909_v56 = vshrl.u32 %v904_v44, 16  ;;  %v912_v61 = vshrl.u32 %v905_v43, 16 }
 0x16f   :  { %v865_v63 = vadd.f32 %v864_v52, %v846_v27 }
 0x170   :  { %v895_v16 = vpack.c.bf16 %v889_v19, %v888_v51  ;;  %v892_v51 = vmax.f32 %v789_v48, 0.0 }
 0x172   :  { %v926_v39 = vunpack.c.l.b16 %v895_v16  ;;  %v927_v36 = vunpack.c.h.b16 %v895_v16 }
 0x173   :  { %v881_v24 = vpop.f32.mrf.mxu2 }
 0x174   :  { %v930_v29 = vpack.c.b16 %v926_v39, %v900_v18  ;;  %v931_v30 = vpack.c.b16 %v927_v36, %v901_v31  ;;  %v970_v37 = vpack.c.b16 %v926_v39, %v926_v39  ;;  %v971_v22 = vpack.c.b16 %v927_v36, %v927_v36 }
 0x175   :  { %v882_v41 = vadd.f32 %v881_v24, %v863_v23 }
 0x176   :  { %v935_v45 = vshrl.u32 %v930_v29, 16  ;;  %v942_v46 = vshrl.u32 %v931_v30, 16  ;;  %v975_v49 = vshll.u32 %v970_v37, 16  ;;  %v979_v25 = vshll.u32 %v971_v22, 16 }
 0x177   :  { %v938_v54 = vshll.u32 %v930_v29, 16  ;;  %v945_v32 = vshll.u32 %v931_v30, 16  ;;  %v891_v60 = vmax.f32 %v882_v41, 0.0 }
 0x178   :  { %v937_v53 = vrot.slane %v935_v45, 7  ;;  %v944_v55 = vrot.slane %v942_v46, 7  ;;  %v977_v58 = vrot.slane %v975_v49, 3  ;;  %v981_v59 = vrot.slane %v979_v25, 3 }
 0x179   :  { %v896_v35 = vpack.c.bf16 %v891_v60, %v890_v2 }
 0x17a   :  { %v940_v28 = vor.u32 %v938_v54, %v937_v53  ;;  %v947_v1 = vor.u32 %v945_v32, %v944_v55  ;;  %v3289_v34 = vsel %vm2813_vm5, %v937_v53, %v977_v58  ;;  %v3311_v9 = vsel %vm2813_vm5, %v944_v55, %v981_v59 }
 0x17b   :  { %v883_v33 = vpop.f32.mrf.mxu2  ;;  %v1010_v21 = vshll.u32 %v3289_v34, 16  ;;  %v1022_v18 = vshll.u32 %v3311_v9, 16  ;;  %v902_v11 = vunpack.c.l.b16 %v896_v35  ;;  %v903_v39 = vunpack.c.h.b16 %v896_v35 }
 0x17c   :  { %v884_v4 = vadd.f32 %v883_v33, %v865_v63  ;;  %v3299_v5 = vsel %vm2813_vm5, %v909_v56, %v940_v28  ;;  %v3303_v7 = vsel %vm2813_vm5, %v912_v61, %v947_v1 }
 0x17d   :  { %v1005_v8 = vshll.u32 %v3299_v5, 16  ;;  %1474 = vmatmul.bf16.vlgmr.msra.gmra.mxu3 %v3299_v5  ;;  %1493 = vmatmul.bf16.vlgmr.msrb.gmra.mxu0 %v3303_v7  ;;  %v1017_v10 = vshll.u32 %v3303_v7, 16  ;;  %v1003_v12 = vshrl.u32 %v3299_v5, 16  ;;  %v1015_v16 = vshrl.u32 %v3303_v7, 16 }
 0x17e   :  { %v893_v19 = vmax.f32 %v884_v4, 0.0  ;;  %v1012_v31 = vrot.slane %v1010_v21, 1  ;;  %v1024_v24 = vrot.slane %v1022_v18, 1  ;;  %v906_v22 = vpack.c.b16 %v902_v11, %v902_v11 }
 0x17f   :  { %v1007_v13 = vrot.slane %v1005_v8, 1  ;;  %v1019_v17 = vrot.slane %v1017_v10, 1  ;;  %v907_v38 = vpack.c.b16 %v903_v39, %v903_v39  ;;  %v1062_v40 = vrot.slane %v3299_v5, 1 }
 0x180   :  { %v897_v15 = vpack.c.bf16 %v893_v19, %v892_v51  ;;  %v915_v27 = vshrl.u32 %v906_v22, 16  ;;  %v1065_v8 = vrot.slane %v3303_v7, 1  ;;  %v1063_v21 = vrot.slane %v3289_v34, 1 }
 0x181   :  { %v1008_v20 = vor.u32 %v1007_v13, %v1003_v12  ;;  %v1020_v14 = vor.u32 %v1019_v17, %v1015_v16  ;;  %v918_v52 = vshrl.u32 %v907_v38, 16  ;;  %v1066_v51 = vrot.slane %v3311_v9, 1 }
 0x182   :  { %v928_v36 = vunpack.c.l.b16 %v897_v15  ;;  %v929_v6 = vunpack.c.h.b16 %v897_v15  ;;  %v1064_v19 = vsel %vm171_vm8, %v1062_v40, %v1063_v21  ;;  %v2391_v40 = vld [vmem:[%s3377_s7] sm:$0xff] }
 0x183   :  { %v1013_v23 = vsel %vm142_vm9, %v1008_v20, %v1012_v31  ;;  %v1025_v37 = vsel %vm142_vm9, %v1020_v14, %v1024_v24  ;;  %v1067_v10 = vsel %vm171_vm8, %v1065_v8, %v1066_v51  ;;  %v2398_v24 = vld [vmem:[%s3377_s7 + $0x38] sm:$0xff] }
 0x184   :  { %v932_v62 = vpack.c.b16 %v928_v36, %v902_v11  ;;  %v933_v50 = vpack.c.b16 %v929_v6, %v903_v39  ;;  %v972_v29 = vpack.c.b16 %v928_v36, %v928_v36  ;;  %v973_v30 = vpack.c.b16 %v929_v6, %v929_v6  ;;  %1512 = vmatmul.bf16.vlgmr.msrb.gmra.mxu1 %v1013_v23  ;;  %v2401_v39 = vld [vmem:[%s3376_s6] ss:$0 sm:$0xff] }
 0x185   :  { %1531 = vmatmul.bf16.vlgmr.msrb.gmra.mxu2 %v1025_v37  ;;  %1676 = vmatpush.bf16.msra.mxu1 %v2398_v24 }
 0x186   :  { %v949_v44 = vshrl.u32 %v932_v62, 16  ;;  %v956_v41 = vshrl.u32 %v933_v50, 16  ;;  %v983_v42 = vshll.u32 %v972_v29, 16  ;;  %v987_v26 = vshll.u32 %v973_v30, 16  ;;  %v2397_v30 = vld [vmem:[%s3377_s7 + $0x30] sm:$0xff] }
 0x187   :  { %v952_v45 = vshll.u32 %v932_v62, 16  ;;  %v959_v48 = vshll.u32 %v933_v50, 16 }
 0x188   :  { %v951_v43 = vrot.slane %v949_v44, 7  ;;  %v958_v46 = vrot.slane %v956_v41, 7  ;;  %v985_v49 = vrot.slane %v983_v42, 3  ;;  %v989_v25 = vrot.slane %v987_v26, 3  ;;  %v2396_v42 = vld [vmem:[%s3377_s7 + $0x28] sm:$0xff] }
 0x189   :  { %1677 = vmatpush.bf16.msra.mxu1 %v2397_v30 }
 0x18a   :  { %v954_v57 = vor.u32 %v952_v45, %v951_v43  ;;  %v961_v47 = vor.u32 %v959_v48, %v958_v46  ;;  %v1000_v53 = vsel %vm2813_vm5, %v951_v43, %v985_v49  ;;  %v1001_v54 = vsel %vm2813_vm5, %v958_v46, %v989_v25  ;;  %v2395_v46 = vld [vmem:[%s3377_s7 + $0x20] sm:$0xff] }
 0x18b   :  { %v1034_v58 = vshll.u32 %v1000_v53, 16  ;;  %v1046_v60 = vshll.u32 %v1001_v54, 16  ;;  %v1069_v15 = vrot.slane %v1000_v53, 1  ;;  %v1072_v16 = vrot.slane %v1001_v54, 1  ;;  %v2394_v53 = vld [vmem:[%s3377_s7 + $0x18] sm:$0xff] }
 0x18c   :  { %v996_v55 = vsel %vm2813_vm5, %v915_v27, %v954_v57  ;;  %v997_v32 = vsel %vm2813_vm5, %v918_v52, %v961_v47 }
 0x18d   :  { %1479 = vmatmul.bf16.gmra.mxu3 %v996_v55  ;;  %1498 = vmatmul.bf16.gmra.mxu0 %v997_v32  ;;  %v1029_v56 = vshll.u32 %v996_v55, 16  ;;  %v1041_v59 = vshll.u32 %v997_v32, 16  ;;  %v1027_v61 = vshrl.u32 %v996_v55, 16  ;;  %v1039_v28 = vshrl.u32 %v997_v32, 16 }
 0x18e   :  { %v1036_v33 = vrot.slane %v1034_v58, 1  ;;  %v1048_v0 = vrot.slane %v1046_v60, 1  ;;  %v1068_v12 = vrot.slane %v996_v55, 1  ;;  %v1071_v13 = vrot.slane %v997_v32, 1  ;;  %1678 = vmatpush.bf16.msra.mxu1 %v2396_v42  ;;  %v2393_v60 = vld [vmem:[%s3377_s7 + $0x10] sm:$0xff] }
 0x18f   :  { %v1031_v63 = vrot.slane %v1029_v56, 1  ;;  %v1043_v1 = vrot.slane %v1041_v59, 1 }
 0x190   :  { %v1070_v17 = vsel %vm171_vm8, %v1068_v12, %v1069_v15  ;;  %v1073_v5 = vsel %vm171_vm8, %v1071_v13, %v1072_v16 }
 0x191   :  { %v1032_v2 = vor.u32 %v1031_v63, %v1027_v61  ;;  %v1044_v3 = vor.u32 %v1043_v1, %v1039_v28  ;;  %v2392_v1 = vld [vmem:[%s3377_s7 + $0x8] sm:$0xff] }
 0x192   :  { %1679 = vmatpush.bf16.msra.mxu1 %v2395_v46 }
 0x193   :  { %v1037_v4 = vsel %vm142_vm9, %v1032_v2, %v1036_v33  ;;  %v1049_v35 = vsel %vm142_vm9, %v1044_v3, %v1048_v0 }
 0x194   :  { %1517 = vmatmul.bf16.gmra.mxu1 %v1037_v4 }
 0x195   :  { %1536 = vmatmul.bf16.gmra.mxu2 %v1049_v35 }
 0x196   :  { %1680 = vmatpush.bf16.msra.mxu1 %v2394_v53 }
 0x19a   :  { %1681 = vmatpush.bf16.msra.mxu1 %v2393_v60 }
 0x19d   :  { %1550 = vmatmul.bf16.vlgmr.msrb.gmra.mxu3 %v1064_v19  ;;  %1569 = vmatmul.bf16.vlgmr.msra.gmra.mxu0 %v1067_v10 }
 0x19e   :  { %1682 = vmatpush.bf16.msra.mxu1 %v2392_v1 }
 0x1a2   :  { %1683 = vmatpush.bf16.msra.mxu1 %v2391_v40 }
 0x1ad   :  { %1555 = vmatmul.bf16.gmra.mxu3 %v1070_v17  ;;  %1574 = vmatmul.bf16.gmra.mxu0 %v1073_v5 }
 0x1fa   :  { %v1494_v7 = vpop.f32.mrf.mxu0 }
 0x200   :  { %v1475_v34 = vpop.f32.mrf.mxu3 }
 0x201   :  { %v1513_v36 = vpop.f32.mrf.mxu1  ;;  %v1476_v14 = vadd.f32 %v2401_v39, %v1475_v34 }
 0x202   :  { %v1496_v18 = vpop.f32.mrf.mxu0 }
 0x203   :  { %v1495_v62 = vadd.f32 %v1494_v7, %v1476_v14 }
 0x205   :  { %v1514_v22 = vadd.f32 %v1513_v36, %v1495_v62 }
 0x208   :  { %v1477_v9 = vpop.f32.mrf.mxu3  ;;  %v1532_v6 = vpop.f32.mrf.mxu2 }
 0x209   :  { %v1478_v50 = vadd.f32 %v2401_v39, %v1477_v9  ;;  %v1515_v37 = vpop.f32.mrf.mxu1  ;;  %v1533_v26 = vadd.f32 %v1532_v6, %v1514_v22 }
 0x20a   :  { %v1499_v11 = vpop.f32.mrf.mxu0 }
 0x20b   :  { %v1497_v38 = vadd.f32 %v1496_v18, %v1478_v50 }
 0x20d   :  { %v1516_v43 = vadd.f32 %v1515_v37, %v1497_v38  ;;  %v2402_v37 = vld [vmem:[%s3378_s8] ss:$0 sm:$0xff] }
 0x210   :  { %v1480_v20 = vpop.f32.mrf.mxu3  ;;  %v1534_v44 = vpop.f32.mrf.mxu2 }
 0x211   :  { %v1535_v49 = vadd.f32 %v1534_v44, %v1516_v43  ;;  %v1481_v25 = vadd.f32 %v2401_v39, %v1480_v20  ;;  %v1518_v27 = vpop.f32.mrf.mxu1 }
 0x212   :  { %v1501_v31 = vpop.f32.mrf.mxu0 }
 0x213   :  { %v1500_v55 = vadd.f32 %v1499_v11, %v1481_v25 }
 0x215   :  { %v1519_v61 = vadd.f32 %v1518_v27, %v1500_v55 }
 0x218   :  { %v1482_v23 = vpop.f32.mrf.mxu3  ;;  %v1537_v54 = vpop.f32.mrf.mxu2 }
 0x219   :  { %v1483_v32 = vadd.f32 %v2401_v39, %v1482_v23  ;;  %v1520_v3 = vpop.f32.mrf.mxu1  ;;  %v1538_v0 = vadd.f32 %v1537_v54, %v1519_v61 }
 0x21a   :  { %v1570_v29 = vpop.f32.mrf.mxu0 }
 0x21b   :  { %v1502_v63 = vadd.f32 %v1501_v31, %v1483_v32 }
 0x21d   :  { %v1521_v4 = vadd.f32 %v1520_v3, %v1502_v63 }
 0x220   :  { %v1551_v41 = vpop.f32.mrf.mxu3  ;;  %v1539_v8 = vpop.f32.mrf.mxu2 }
 0x221   :  { %v1552_v45 = vadd.f32 %v1551_v41, %v1533_v26  ;;  %v1540_v51 = vadd.f32 %v1539_v8, %v1521_v4 }
 0x222   :  { %v1572_v48 = vpop.f32.mrf.mxu0 }
 0x223   :  { %v1571_v57 = vadd.f32 %v1570_v29, %v1552_v45 }
 0x225   :  { %v1580_v58 = vmax.f32 %v1571_v57, 0.0 }
 0x228   :  { %v1553_v52 = vpop.f32.mrf.mxu3 }
 0x229   :  { %v1554_v47 = vadd.f32 %v1553_v52, %v1535_v49 }
 0x22a   :  { %v1575_v2 = vpop.f32.mrf.mxu0 }
 0x22b   :  { %v1573_v56 = vadd.f32 %v1572_v48, %v1554_v47 }
 0x22d   :  { %v1581_v59 = vmax.f32 %v1573_v56, 0.0 }
 0x22f   :  { %v1584_v28 = vadd.f32 %v1581_v59, %v1580_v58 }
 0x230   :  { %v1556_v33 = vpop.f32.mrf.mxu3 }
 0x231   :  { %v1585_v35 = vrot.slane %v1584_v28, 4  ;;  %v1557_v21 = vadd.f32 %v1556_v33, %v1538_v0 }
 0x232   :  { %v1577_v15 = vpop.f32.mrf.mxu0 }
 0x233   :  { %v1586_v19 = vadd.f32 %v1585_v35, %v1584_v28  ;;  %v1576_v12 = vadd.f32 %v1575_v2, %v1557_v21 }
 0x235   :  { %v1587_v16 = vrot.slane %v1586_v19, 2  ;;  %v1582_v5 = vmax.f32 %v1576_v12, 0.0 }
 0x237   :  { %v1588_v34 = vadd.f32 %v1587_v16, %v1586_v19 }
 0x238   :  { %v1558_v10 = vpop.f32.mrf.mxu3 }
 0x239   :  { %v1559_v13 = vadd.f32 %v1558_v10, %v1540_v51  ;;  %v1589_v11 = vrot.slane %v1588_v34, 1 }
 0x23b   :  { %v1578_v17 = vadd.f32 %v1577_v15, %v1559_v13  ;;  %v1590_v39 = vadd.f32 %v1589_v11, %v1588_v34 }
 0x23d   :  { %v1583_v7 = vmax.f32 %v1578_v17, 0.0  ;;  %v1598_v14 = vpack.c.bf16 %v1590_v39, %v1590_v39 }
 0x23f   :  { %v1591_v18 = vadd.f32 %v1583_v7, %v1582_v5  ;;  %v1622_v62 = vunpack.c.l.b16 %v1598_v14 }
 0x241   :  { %v1592_v9 = vrot.slane %v1591_v18, 4 }
 0x243   :  { %v1593_v20 = vadd.f32 %v1592_v9, %v1591_v18 }
 0x245   :  { %v1594_v31 = vrot.slane %v1593_v20, 2 }
 0x247   :  { %v1595_v36 = vadd.f32 %v1594_v31, %v1593_v20 }
 0x249   :  { %v1596_v6 = vrot.slane %v1595_v36, 1 }
 0x24b   :  { %v1597_v23 = vadd.f32 %v1596_v6, %v1595_v36 }
 0x24d   :  { %v1599_v24 = vpack.c.bf16 %v1597_v23, %v1597_v23 }
 0x24f   :  { %v1623_v50 = vunpack.c.l.b16 %v1599_v24 }
 0x251   :  { %v1625_v29 = vsel %vm1624_vm12, %v1623_v50, %v1622_v62 }
 0x252   :  { %v1626_v30 = vpack.c.b16 %v1625_v29, %v1625_v29 }
 0x254   :  { %1684 = vmatmul.bf16.vlgmr.msra.gmra.mxu1 %v1626_v30 }
 0x2d1   :  { %v1685_v22 = vpop.f32.mrf.mxu1 }
 0x2d2   :  { %v1686_v38 = vadd.f32 %v2402_v37, %v1685_v22 }
 0x2d4   :  { %1690 = vst.msk [vmem:[#allocation2] sm:$0x3] %vm1689_vm13, %v1686_v38 }
 0x2d5   :  { %1701 = dma.vmem_to_hbm [thread:$0]  %s1697_s18, 32, %s1699_s20, [#allocation3]  }
 0x2d9   :  { %v1687_v44 = vpop.f32.mrf.mxu1 }
 0x2da   :  { %2427 = dma.done.wait [#allocation3], 32  }
 0x2db   :  { %2428 = vsyncadd [#allocation3], 4294967264 }
 0x2dc   :  { %1706 = vsyncpa [#allocation3], 1 }

</bundles_post_ra>
